<compile_context>
chip_gen: v6e
topology: v6e:2x2x1
jax: 0.10.0
libtpu: 0.0.40
codegen_flags: <defaults>
</compile_context>

<pallas_src>
import functools
import math

import jax
import jax.numpy as jnp
from jax.experimental import pallas as pl
from jax.experimental.pallas import tpu as pltpu


# ----------------------------- in-kernel helpers -----------------------------

def _layer_norm(x, g, b, eps=1e-5):
    mu = jnp.mean(x, axis=-1, keepdims=True)
    var = jnp.mean((x - mu) ** 2, axis=-1, keepdims=True)
    return (x - mu) * jax.lax.rsqrt(var + eps) * g + b


def _new_gelu(x):
    c = math.sqrt(2.0 / math.pi)
    return 0.5 * x * (1.0 + jnp.tanh(c * (x + 0.044715 * x * x * x)))


# ------------------------------- Pallas kernels ------------------------------

def _block_kernel(x_ref, ln1g_ref, ln1b_ref,
                  wq_ref, bq_ref, wk_ref, bk_ref, wv_ref, bv_ref,
                  wproj_ref, bproj_ref, ln2g_ref, ln2b_ref,
                  wfc_ref, bfc_ref, wfp_ref, bfp_ref, o_ref, *, n_head):
    """All transformer blocks for one batch element.

    Grid is (B, L); the layer axis is the inner "arbitrary" axis.  The output
    block is resident across the layer axis and doubles as the activation
    carry:  o <- o + attn(ln1(o));  o <- o + mlp(ln2(o)).
    """
    bf16 = jnp.bfloat16
    f32 = jnp.float32

    layer = pl.program_id(1)

    # Seed the resident activation from the embedding input at layer 0.
    @pl.when(layer == 0)
    def _():
        o_ref[...] = x_ref[...]

    x = o_ref[...]                                   # (1, T, C) f32
    _, T, C = x.shape
    hd = C // n_head
    xf = x.reshape(T, C)

    # ---- attention branch ----
    h = _layer_norm(xf, ln1g_ref[...], ln1b_ref[...])
    h_bf = h.astype(bf16)
    # Three full-width C-contraction matmuls (weights already bf16).
    q = jnp.dot(h_bf, wq_ref[...], preferred_element_type=f32) + bq_ref[...]
    k = jnp.dot(h_bf, wk_ref[...], preferred_element_type=f32) + bk_ref[...]
    v = jnp.dot(h_bf, wv_ref[...], preferred_element_type=f32) + bv_ref[...]

    # Heads batched as a leading dim: (H, T, hd).
    qh = q.reshape(T, n_head, hd).transpose(1, 0, 2)
    kh = k.reshape(T, n_head, hd).transpose(1, 0, 2)
    vh = v.reshape(T, n_head, hd).transpose(1, 0, 2)

    scale = 1.0 / math.sqrt(hd)
    att = jnp.einsum('hqd,hkd->hqk', qh.astype(bf16), kh.astype(bf16),
                     preferred_element_type=f32) * scale          # (H, T, T) f32

    row = jax.lax.broadcasted_iota(jnp.int32, (T, T), 0)
    col = jax.lax.broadcasted_iota(jnp.int32, (T, T), 1)
    causal = row >= col
    att = jnp.where(causal[None], att, jnp.float32(-jnp.inf))

    # softmax in f32; EUP reciprocal instead of a VALU divide.
    att = att - jnp.max(att, axis=-1, keepdims=True)
    p = jnp.exp(att)
    p = p * pl.reciprocal(jnp.sum(p, axis=-1, keepdims=True), approx=True)

    # TODO(synk): switch to flash-style online softmax over kv tiles once T
    # grows past a few hundred (full (H,T,T) scores won't fit VMEM on v7x).
    y = jnp.einsum('hqk,hkd->hqd', p.astype(bf16), vh.astype(bf16),
                   preferred_element_type=f32)                    # (H, T, hd)
    y = y.transpose(1, 0, 2).reshape(T, C)

    # One full-width output projection.
    proj = jnp.dot(y.astype(bf16), wproj_ref[...],
                   preferred_element_type=f32) + bproj_ref[...]
    x1 = xf + proj

    # ---- MLP branch ----
    h2 = _layer_norm(x1, ln2g_ref[...], ln2b_ref[...])
    ff = jnp.dot(h2.astype(bf16), wfc_ref[...],
                 preferred_element_type=f32) + bfc_ref[...]
    ff = _new_gelu(ff)                                            # f32 elementwise
    ff = jnp.dot(ff.astype(bf16), wfp_ref[...],
                 preferred_element_type=f32) + bfp_ref[...]

    o_ref[...] = (x1 + ff).reshape(1, T, C)


def _head_kernel(x_ref, lng_ref, lnb_ref, wlm_ref, o_ref):
    """Final LayerNorm + LM head (no bias) for one (row-tile, vocab-tile)."""
    xf = _layer_norm(x_ref[...], lng_ref[...], lnb_ref[...])
    o_ref[...] = jnp.dot(xf.astype(jnp.bfloat16), wlm_ref[...],
                         preferred_element_type=jnp.float32)


# ------------------------------ pallas_call glue ------------------------------

_VMEM_LIMIT = 48 * 1024 * 1024     # stay under v7x's 64 MiB physical VMEM


def run_blocks(x, blocks, n_head):
    """Run all transformer blocks in a single pallas_call (grid = (B, L))."""
    B, T, C = x.shape
    L = len(blocks)
    bf16 = jnp.bfloat16

    def stack(name):
        return jnp.stack([bp[name] for bp in blocks], axis=0)

    # Split the fused c_attn weight into Q/K/V outside the kernel (plain JAX),
    # so the kernel never slices a 3C lane dim; MXU weights go in as bf16.
    w_attn = stack('w_attn')                         # (L, C, 3C)
    b_attn = stack('b_attn')                         # (L, 1, 3C)
    wq = w_attn[:, :, :C].astype(bf16)
    wk = w_attn[:, :, C:2 * C].astype(bf16)
    wv = w_attn[:, :, 2 * C:].astype(bf16)
    bq, bk, bv = b_attn[:, :, :C], b_attn[:, :, C:2 * C], b_attn[:, :, 2 * C:]

    args = (x,
            stack('ln1_g'), stack('ln1_b'),
            wq, bq, wk, bk, wv, bv,
            stack('w_proj').astype(bf16), stack('b_proj'),
            stack('ln2_g'), stack('ln2_b'),
            stack('w_fc').astype(bf16), stack('b_fc'),
            stack('w_fcproj').astype(bf16), stack('b_fcproj'))

    def layer_spec(a):
        rest = a.shape[1:]                           # drop the leading layer dim
        return pl.BlockSpec(
            (None,) + rest,                          # layer dim squeezed in-kernel
            lambda b, l, _nd=len(rest): (l,) + (0,) * _nd)

    in_specs = [pl.BlockSpec((1, T, C), lambda b, l: (b, 0, 0))]
    in_specs += [layer_spec(a) for a in args[1:]]

    return pl.pallas_call(
        functools.partial(_block_kernel, n_head=n_head),
        out_shape=jax.ShapeDtypeStruct((B, T, C), jnp.float32),
        grid=(B, L),
        in_specs=in_specs,
        # Output block index constant along the layer axis -> activation stays
        # resident in VMEM for the whole layer stack of a given batch element.
        out_specs=pl.BlockSpec((1, T, C), lambda b, l: (b, 0, 0)),
        compiler_params=pltpu.CompilerParams(
            dimension_semantics=("parallel", "arbitrary"),
            vmem_limit_bytes=_VMEM_LIMIT),
    )(*args)


def run_head(x, lng, lnb, wlm):
    B, T, C = x.shape
    V = wlm.shape[1]
    BT = B * T
    xf = x.reshape(BT, C)                      # flatten rows outside the kernel

    # Row / vocab tile selection (TM multiple of 8, TV multiple of 128 or == V).
    tm = 256 if BT % 256 == 0 else (8 if BT % 8 == 0 else BT)
    tv = 2048 if V % 2048 == 0 else (512 if V % 512 == 0 else
                                     (128 if V % 128 == 0 else V))
    assert BT % tm == 0 and V % tv == 0

    wlm_bf = wlm.astype(jnp.bfloat16)
    out = pl.pallas_call(
        _head_kernel,
        out_shape=jax.ShapeDtypeStruct((BT, V), jnp.float32),
        grid=(BT // tm, V // tv),
        in_specs=[
            pl.BlockSpec((tm, C), lambda i, j: (i, 0)),
            pl.BlockSpec((1, C), lambda i, j: (0, 0)),
            pl.BlockSpec((1, C), lambda i, j: (0, 0)),
            pl.BlockSpec((C, tv), lambda i, j: (0, j)),
        ],
        out_specs=pl.BlockSpec((tm, tv), lambda i, j: (i, j)),
        compiler_params=pltpu.CompilerParams(
            dimension_semantics=("parallel", "parallel"),
            vmem_limit_bytes=_VMEM_LIMIT),
    )(xf, lng, lnb, wlm_bf)
    return out.reshape(B, T, V)


# ------------------------------ parameters / model ----------------------------

def init_params(key, vocab_size, block_size, n_layer, n_head, n_embd):
    n_rand = 3 + 8 * n_layer
    keys = iter(jax.random.split(key, n_rand))

    def nrm(shape, scale=0.02):
        return (scale * jax.random.normal(next(keys), shape)).astype(jnp.float32)

    params = {
        'wte': nrm((vocab_size, n_embd)),
        'wpe': nrm((block_size, n_embd)),
        'lnf_g': jnp.ones((1, n_embd), jnp.float32),
        'lnf_b': jnp.zeros((1, n_embd), jnp.float32),
        'w_lm': nrm((n_embd, vocab_size)),
        'blocks': [],
    }
    for _ in range(n_layer):
        params['blocks'].append(dict(
            ln1_g=jnp.ones((1, n_embd), jnp.float32),
            ln1_b=jnp.zeros((1, n_embd), jnp.float32),
            w_attn=nrm((n_embd, 3 * n_embd)),
            b_attn=nrm((1, 3 * n_embd)),
            w_proj=nrm((n_embd, n_embd)),
            b_proj=nrm((1, n_embd)),
            ln2_g=jnp.ones((1, n_embd), jnp.float32),
            ln2_b=jnp.zeros((1, n_embd), jnp.float32),
            w_fc=nrm((n_embd, 4 * n_embd)),
            b_fc=nrm((1, 4 * n_embd)),
            w_fcproj=nrm((4 * n_embd, n_embd)),
            b_fcproj=nrm((1, n_embd)),
        ))
    return params


def transformer_forward(params, idx, n_head):
    """Pallas forward.  idx: (B, T) int32 -> logits (B, T, vocab)."""
    B, T = idx.shape
    # TODO(synk): embedding gather done in plain JAX (glue); could be a
    # scalar-prefetch + pl.Element gather kernel if it ever matters.
    tok_emb = params['wte'][idx]                     # (B, T, C)
    pos_emb = params['wpe'][:T][None]                # (1, T, C)
    x = tok_emb + pos_emb
    x = run_blocks(x, params['blocks'], n_head)
    return run_head(x, params['lnf_g'], params['lnf_b'], params['w_lm'])


# ----------------------------- pure-JAX reference -----------------------------
# Mirrors the kernel's precision policy (bf16 MXU operands, f32 accumulation,
# f32 softmax/GELU) so the tolerance stays tight; the only deliberate
# difference is the kernel's approx reciprocal in the softmax.

def reference_forward(params, idx, n_head):
    bf16, f32 = jnp.bfloat16, jnp.float32

    def mm(a, w):
        return jnp.dot(a.astype(bf16), w.astype(bf16), preferred_element_type=f32)

    B, T = idx.shape
    x = params['wte'][idx] + params['wpe'][:T][None]
    C = x.shape[-1]
    hd = C // n_head
    mask = jnp.tril(jnp.ones((T, T), jnp.float32))
    for lp in params['blocks']:
        h = _layer_norm(x, lp['ln1_g'], lp['ln1_b'])
        qkv = mm(h, lp['w_attn']) + lp['b_attn']
        q, k, v = jnp.split(qkv, 3, axis=-1)
        q = q.reshape(B, T, n_head, hd).transpose(0, 2, 1, 3)
        k = k.reshape(B, T, n_head, hd).transpose(0, 2, 1, 3)
        v = v.reshape(B, T, n_head, hd).transpose(0, 2, 1, 3)
        att = jnp.einsum('bhqd,bhkd->bhqk', q.astype(bf16), k.astype(bf16),
                         preferred_element_type=f32) * (1.0 / math.sqrt(hd))
        att = jnp.where(mask[None, None] == 0, -jnp.inf, att)
        att = jax.nn.softmax(att, axis=-1)
        y = jnp.einsum('bhqk,bhkd->bhqd', att.astype(bf16), v.astype(bf16),
                       preferred_element_type=f32)
        y = y.transpose(0, 2, 1, 3).reshape(B, T, C)
        x = x + mm(y, lp['w_proj']) + lp['b_proj']
        h2 = _layer_norm(x, lp['ln2_g'], lp['ln2_b'])
        ff = _new_gelu(mm(h2, lp['w_fc']) + lp['b_fc'])
        x = x + mm(ff, lp['w_fcproj']) + lp['b_fcproj']
    x = _layer_norm(x, params['lnf_g'], params['lnf_b'])
    return mm(x, params['w_lm'])


# ------------------------------------ main ------------------------------------

if __name__ == "__main__":
    # small GPT config
    vocab_size, block_size = 64, 16
    n_layer, n_head, n_embd = 2, 4, 32
    B, T = 2, 8

    key = jax.random.PRNGKey(0)
    k_param, k_idx = jax.random.split(key)
    params = init_params(k_param, vocab_size, block_size, n_layer, n_head, n_embd)
    idx = jax.random.randint(k_idx, (B, T), 0, vocab_size, dtype=jnp.int32)

    fwd = jax.jit(transformer_forward, static_argnums=2)
    logits = fwd(params, idx, n_head)
    logits = jax.block_until_ready(logits)

    ref = reference_forward(params, idx, n_head)
    assert logits.shape == (B, T, vocab_size)
    assert jnp.allclose(logits, ref, atol=1e-2, rtol=1e-2), (
        float(jnp.max(jnp.abs(logits - ref))))

    print("KERNEL_OK")
</pallas_src>

<mosaic_0001>
module attributes {stable_mosaic.version = 11 : i64} {
  func.func @_head_kernel(%arg0: i32, %arg1: i32, %arg2: memref<8x32xf32, #tpu.memory_space<vmem>>, %arg3: memref<1x32xf32, #tpu.memory_space<vmem>>, %arg4: memref<1x32xf32, #tpu.memory_space<vmem>>, %arg5: memref<32x64xbf16, #tpu.memory_space<vmem>>, %arg6: memref<8x64xf32, #tpu.memory_space<vmem>>) attributes {dimension_semantics = [#tpu.dimension_semantics<parallel>, #tpu.dimension_semantics<parallel>], iteration_bounds = array<i64: 2, 1>, scalar_prefetch = 0 : i64, scratch_operands = 0 : i64, tpu.core_type = #tpu.core_type<tc>, window_params = [{transform_indices = @transform_0, window_bounds = array<i64: 8, 32>}, {pipeline_mode = #tpu.pipeline_mode<synchronous>, transform_indices = @transform_1, window_bounds = array<i64: 1, 32>}, {pipeline_mode = #tpu.pipeline_mode<synchronous>, transform_indices = @transform_2, window_bounds = array<i64: 1, 32>}, {transform_indices = @transform_3, window_bounds = array<i64: 32, 64>}, {transform_indices = @transform_4, window_bounds = array<i64: 8, 64>}]} {
    %c0 = arith.constant 0 : index
    %c0_0 = arith.constant 0 : index
    %0 = vector.load %arg2[%c0, %c0_0] : memref<8x32xf32, #tpu.memory_space<vmem>>, vector<8x32xf32>
    %c0_1 = arith.constant 0 : index
    %c0_2 = arith.constant 0 : index
    %1 = vector.load %arg3[%c0_1, %c0_2] : memref<1x32xf32, #tpu.memory_space<vmem>>, vector<1x32xf32>
    %c0_3 = arith.constant 0 : index
    %c0_4 = arith.constant 0 : index
    %2 = vector.load %arg4[%c0_3, %c0_4] : memref<1x32xf32, #tpu.memory_space<vmem>>, vector<1x32xf32>
    %cst = arith.constant dense<0.000000e+00> : vector<8xf32>
    %3 = vector.multi_reduction <add>, %0, %cst [1] : vector<8x32xf32> to vector<8xf32>
    %4 = vector.shape_cast %3 : vector<8xf32> to vector<8x1xf32>
    %cst_5 = arith.constant 3.200000e+01 : f32
    %5 = vector.broadcast %cst_5 : f32 to vector<8x1xf32>
    %6 = arith.divf %4, %5 : vector<8x1xf32>
    %7 = vector.broadcast %6 : vector<8x1xf32> to vector<8x32xf32>
    %8 = arith.subf %0, %7 : vector<8x32xf32>
    %9 = arith.mulf %8, %8 : vector<8x32xf32>
    %cst_6 = arith.constant dense<0.000000e+00> : vector<8xf32>
    %10 = vector.multi_reduction <add>, %9, %cst_6 [1] : vector<8x32xf32> to vector<8xf32>
    %11 = vector.shape_cast %10 : vector<8xf32> to vector<8x1xf32>
    %cst_7 = arith.constant 3.200000e+01 : f32
    %12 = vector.broadcast %cst_7 : f32 to vector<8x1xf32>
    %13 = arith.divf %11, %12 : vector<8x1xf32>
    %14 = vector.broadcast %6 : vector<8x1xf32> to vector<8x32xf32>
    %15 = arith.subf %0, %14 : vector<8x32xf32>
    %cst_8 = arith.constant 9.99999974E-6 : f32
    %16 = vector.broadcast %cst_8 : f32 to vector<8x1xf32>
    %17 = arith.addf %13, %16 : vector<8x1xf32>
    %18 = math.rsqrt %17 : vector<8x1xf32>
    %19 = vector.broadcast %18 : vector<8x1xf32> to vector<8x32xf32>
    %20 = arith.mulf %15, %19 : vector<8x32xf32>
    %21 = vector.broadcast %1 : vector<1x32xf32> to vector<8x32xf32>
    %22 = arith.mulf %20, %21 : vector<8x32xf32>
    %23 = vector.broadcast %2 : vector<1x32xf32> to vector<8x32xf32>
    %24 = arith.addf %22, %23 : vector<8x32xf32>
    %25 = arith.truncf %24 : vector<8x32xf32> to vector<8x32xbf16>
    %c0_9 = arith.constant 0 : index
    %c0_10 = arith.constant 0 : index
    %26 = vector.load %arg5[%c0_9, %c0_10] : memref<32x64xbf16, #tpu.memory_space<vmem>>, vector<32x64xbf16>
    %cst_11 = arith.constant dense<0.000000e+00> : vector<8x64xf32>
    %27 = tpu.matmul %25, %26, %cst_11 {dimension_numbers = #tpu.dot_dimension_numbers<[1], [0], [0], [1], [0, 0, 1, 1], [], []>} : vector<8x32xbf16>, vector<32x64xbf16>, vector<8x64xf32> -> vector<8x64xf32>
    %c0_12 = arith.constant 0 : index
    %c0_13 = arith.constant 0 : index
    %28 = vector.load %arg6[%c0_12, %c0_13] : memref<8x64xf32, #tpu.memory_space<vmem>>, vector<8x64xf32>
    tpu.vector_store %arg6[%c0_12, %c0_13], %27 {strides = array<i32>} : memref<8x64xf32, #tpu.memory_space<vmem>>, vector<8x64xf32>,
    return
  }
  func.func @transform_0(%arg0: i32, %arg1: i32) -> (i32, i32) {
    %c0_i32 = arith.constant 0 : i32
    %c0_i32_0 = arith.constant 0 : i32
    return %arg0, %c0_i32 : i32, i32
  }
  func.func @transform_1(%arg0: i32, %arg1: i32) -> (i32, i32) {
    %c0_i32 = arith.constant 0 : i32
    %c0_i32_0 = arith.constant 0 : i32
    %c0_i32_1 = arith.constant 0 : i32
    return %c0_i32, %c0_i32_0 : i32, i32
  }
  func.func @transform_2(%arg0: i32, %arg1: i32) -> (i32, i32) {
    %c0_i32 = arith.constant 0 : i32
    %c0_i32_0 = arith.constant 0 : i32
    %c0_i32_1 = arith.constant 0 : i32
    return %c0_i32, %c0_i32_0 : i32, i32
  }
  func.func @transform_3(%arg0: i32, %arg1: i32) -> (i32, i32) {
    %c0_i32 = arith.constant 0 : i32
    %c0_i32_0 = arith.constant 0 : i32
    return %c0_i32, %arg1 : i32, i32
  }
  func.func @transform_4(%arg0: i32, %arg1: i32) -> (i32, i32) {
    %c0_i32 = arith.constant 0 : i32
    return %arg0, %arg1 : i32, i32
  }
}

module attributes {stable_mosaic.version = 11 : i64} {
  func.func @_block_kernel(%arg0: i32, %arg1: i32, %arg2: memref<1x8x32xf32, #tpu.memory_space<vmem>>, %arg3: memref<1x1x32xf32, #tpu.memory_space<vmem>>, %arg4: memref<1x1x32xf32, #tpu.memory_space<vmem>>, %arg5: memref<1x32x32xbf16, #tpu.memory_space<vmem>>, %arg6: memref<1x1x32xf32, #tpu.memory_space<vmem>>, %arg7: memref<1x32x32xbf16, #tpu.memory_space<vmem>>, %arg8: memref<1x1x32xf32, #tpu.memory_space<vmem>>, %arg9: memref<1x32x32xbf16, #tpu.memory_space<vmem>>, %arg10: memref<1x1x32xf32, #tpu.memory_space<vmem>>, %arg11: memref<1x32x32xbf16, #tpu.memory_space<vmem>>, %arg12: memref<1x1x32xf32, #tpu.memory_space<vmem>>, %arg13: memref<1x1x32xf32, #tpu.memory_space<vmem>>, %arg14: memref<1x1x32xf32, #tpu.memory_space<vmem>>, %arg15: memref<1x32x128xbf16, #tpu.memory_space<vmem>>, %arg16: memref<1x1x128xf32, #tpu.memory_space<vmem>>, %arg17: memref<1x128x32xbf16, #tpu.memory_space<vmem>>, %arg18: memref<1x1x32xf32, #tpu.memory_space<vmem>>, %arg19: memref<1x8x32xf32, #tpu.memory_space<vmem>>) attributes {dimension_semantics = [#tpu.dimension_semantics<parallel>, #tpu.dimension_semantics<arbitrary>], iteration_bounds = array<i64: 2, 2>, scalar_prefetch = 0 : i64, scratch_operands = 0 : i64, tpu.core_type = #tpu.core_type<tc>, window_params = [{transform_indices = @transform_0, window_bounds = array<i64: 1, 8, 32>}, {transform_indices = @transform_1, window_bounds = array<i64: 1, 1, 32>}, {transform_indices = @transform_2, window_bounds = array<i64: 1, 1, 32>}, {transform_indices = @transform_3, window_bounds = array<i64: 1, 32, 32>}, {transform_indices = @transform_4, window_bounds = array<i64: 1, 1, 32>}, {transform_indices = @transform_5, window_bounds = array<i64: 1, 32, 32>}, {transform_indices = @transform_6, window_bounds = array<i64: 1, 1, 32>}, {transform_indices = @transform_7, window_bounds = array<i64: 1, 32, 32>}, {transform_indices = @transform_8, window_bounds = array<i64: 1, 1, 32>}, {transform_indices = @transform_9, window_bounds = array<i64: 1, 32, 32>}, {transform_indices = @transform_10, window_bounds = array<i64: 1, 1, 32>}, {transform_indices = @transform_11, window_bounds = array<i64: 1, 1, 32>}, {transform_indices = @transform_12, window_bounds = array<i64: 1, 1, 32>}, {transform_indices = @transform_13, window_bounds = array<i64: 1, 32, 128>}, {transform_indices = @transform_14, window_bounds = array<i64: 1, 1, 128>}, {transform_indices = @transform_15, window_bounds = array<i64: 1, 128, 32>}, {transform_indices = @transform_16, window_bounds = array<i64: 1, 1, 32>}, {transform_indices = @transform_17, window_bounds = array<i64: 1, 8, 32>}]} {
    %c0_i32 = arith.constant 0 : i32
    %0 = arith.cmpi eq, %arg1, %c0_i32 : i32
    %1 = arith.extui %0 : i1 to i32
    %c0_i32_0 = arith.constant 0 : i32
    %2 = arith.cmpi ne, %1, %c0_i32_0 : i32
    scf.if %2 {
      %c0_79 = arith.constant 0 : index
      %c0_80 = arith.constant 0 : index
      %c0_81 = arith.constant 0 : index
      %154 = vector.load %arg2[%c0_79, %c0_80, %c0_81] : memref<1x8x32xf32, #tpu.memory_space<vmem>>, vector<1x8x32xf32>
      %c0_82 = arith.constant 0 : index
      %c0_83 = arith.constant 0 : index
      %c0_84 = arith.constant 0 : index
      %155 = vector.load %arg19[%c0_82, %c0_83, %c0_84] : memref<1x8x32xf32, #tpu.memory_space<vmem>>, vector<1x8x32xf32>
      tpu.vector_store %arg19[%c0_82, %c0_83, %c0_84], %154 {strides = array<i32>} : memref<1x8x32xf32, #tpu.memory_space<vmem>>, vector<1x8x32xf32>,
    } else {
    }
    %c0 = arith.constant 0 : index
    %c0_1 = arith.constant 0 : index
    %c0_2 = arith.constant 0 : index
    %3 = vector.load %arg19[%c0, %c0_1, %c0_2] : memref<1x8x32xf32, #tpu.memory_space<vmem>>, vector<1x8x32xf32>
    %4 = vector.shape_cast %3 : vector<1x8x32xf32> to vector<8x32xf32>
    %c0_3 = arith.constant 0 : index
    %c0_4 = arith.constant 0 : index
    %c0_5 = arith.constant 0 : index
    %5 = vector.load %arg3[%c0_3, %c0_4, %c0_5] : memref<1x1x32xf32, #tpu.memory_space<vmem>>, vector<1x1x32xf32>
    %6 = vector.shape_cast %5 : vector<1x1x32xf32> to vector<1x32xf32>
    %c0_6 = arith.constant 0 : index
    %c0_7 = arith.constant 0 : index
    %c0_8 = arith.constant 0 : index
    %7 = vector.load %arg4[%c0_6, %c0_7, %c0_8] : memref<1x1x32xf32, #tpu.memory_space<vmem>>, vector<1x1x32xf32>
    %8 = vector.shape_cast %7 : vector<1x1x32xf32> to vector<1x32xf32>
    %cst = arith.constant dense<0.000000e+00> : vector<8xf32>
    %9 = vector.multi_reduction <add>, %4, %cst [1] : vector<8x32xf32> to vector<8xf32>
    %10 = vector.shape_cast %9 : vector<8xf32> to vector<8x1xf32>
    %cst_9 = arith.constant 3.200000e+01 : f32
    %11 = vector.broadcast %cst_9 : f32 to vector<8x1xf32>
    %12 = arith.divf %10, %11 : vector<8x1xf32>
    %13 = vector.broadcast %12 : vector<8x1xf32> to vector<8x32xf32>
    %14 = arith.subf %4, %13 : vector<8x32xf32>
    %15 = arith.mulf %14, %14 : vector<8x32xf32>
    %cst_10 = arith.constant dense<0.000000e+00> : vector<8xf32>
    %16 = vector.multi_reduction <add>, %15, %cst_10 [1] : vector<8x32xf32> to vector<8xf32>
    %17 = vector.shape_cast %16 : vector<8xf32> to vector<8x1xf32>
    %cst_11 = arith.constant 3.200000e+01 : f32
    %18 = vector.broadcast %cst_11 : f32 to vector<8x1xf32>
    %19 = arith.divf %17, %18 : vector<8x1xf32>
    %20 = vector.broadcast %12 : vector<8x1xf32> to vector<8x32xf32>
    %21 = arith.subf %4, %20 : vector<8x32xf32>
    %cst_12 = arith.constant 9.99999974E-6 : f32
    %22 = vector.broadcast %cst_12 : f32 to vector<8x1xf32>
    %23 = arith.addf %19, %22 : vector<8x1xf32>
    %24 = math.rsqrt %23 : vector<8x1xf32>
    %25 = vector.broadcast %24 : vector<8x1xf32> to vector<8x32xf32>
    %26 = arith.mulf %21, %25 : vector<8x32xf32>
    %27 = vector.broadcast %6 : vector<1x32xf32> to vector<8x32xf32>
    %28 = arith.mulf %26, %27 : vector<8x32xf32>
    %29 = vector.broadcast %8 : vector<1x32xf32> to vector<8x32xf32>
    %30 = arith.addf %28, %29 : vector<8x32xf32>
    %31 = arith.truncf %30 : vector<8x32xf32> to vector<8x32xbf16>
    %c0_13 = arith.constant 0 : index
    %c0_14 = arith.constant 0 : index
    %c0_15 = arith.constant 0 : index
    %32 = vector.load %arg5[%c0_13, %c0_14, %c0_15] : memref<1x32x32xbf16, #tpu.memory_space<vmem>>, vector<1x32x32xbf16>
    %33 = vector.shape_cast %32 : vector<1x32x32xbf16> to vector<32x32xbf16>
    %cst_16 = arith.constant dense<0.000000e+00> : vector<8x32xf32>
    %34 = tpu.matmul %31, %33, %cst_16 {dimension_numbers = #tpu.dot_dimension_numbers<[1], [0], [0], [1], [0, 0, 1, 1], [], []>} : vector<8x32xbf16>, vector<32x32xbf16>, vector<8x32xf32> -> vector<8x32xf32>
    %c0_17 = arith.constant 0 : index
    %c0_18 = arith.constant 0 : index
    %c0_19 = arith.constant 0 : index
    %35 = vector.load %arg6[%c0_17, %c0_18, %c0_19] : memref<1x1x32xf32, #tpu.memory_space<vmem>>, vector<1x1x32xf32>
    %36 = vector.shape_cast %35 : vector<1x1x32xf32> to vector<1x32xf32>
    %37 = vector.broadcast %36 : vector<1x32xf32> to vector<8x32xf32>
    %38 = arith.addf %34, %37 : vector<8x32xf32>
    %c0_20 = arith.constant 0 : index
    %c0_21 = arith.constant 0 : index
    %c0_22 = arith.constant 0 : index
    %39 = vector.load %arg7[%c0_20, %c0_21, %c0_22] : memref<1x32x32xbf16, #tpu.memory_space<vmem>>, vector<1x32x32xbf16>
    %40 = vector.shape_cast %39 : vector<1x32x32xbf16> to vector<32x32xbf16>
    %cst_23 = arith.constant dense<0.000000e+00> : vector<8x32xf32>
    %41 = tpu.matmul %31, %40, %cst_23 {dimension_numbers = #tpu.dot_dimension_numbers<[1], [0], [0], [1], [0, 0, 1, 1], [], []>} : vector<8x32xbf16>, vector<32x32xbf16>, vector<8x32xf32> -> vector<8x32xf32>
    %c0_24 = arith.constant 0 : index
    %c0_25 = arith.constant 0 : index
    %c0_26 = arith.constant 0 : index
    %42 = vector.load %arg8[%c0_24, %c0_25, %c0_26] : memref<1x1x32xf32, #tpu.memory_space<vmem>>, vector<1x1x32xf32>
    %43 = vector.shape_cast %42 : vector<1x1x32xf32> to vector<1x32xf32>
    %44 = vector.broadcast %43 : vector<1x32xf32> to vector<8x32xf32>
    %45 = arith.addf %41, %44 : vector<8x32xf32>
    %c0_27 = arith.constant 0 : index
    %c0_28 = arith.constant 0 : index
    %c0_29 = arith.constant 0 : index
    %46 = vector.load %arg9[%c0_27, %c0_28, %c0_29] : memref<1x32x32xbf16, #tpu.memory_space<vmem>>, vector<1x32x32xbf16>
    %47 = vector.shape_cast %46 : vector<1x32x32xbf16> to vector<32x32xbf16>
    %cst_30 = arith.constant dense<0.000000e+00> : vector<8x32xf32>
    %48 = tpu.matmul %31, %47, %cst_30 {dimension_numbers = #tpu.dot_dimension_numbers<[1], [0], [0], [1], [0, 0, 1, 1], [], []>} : vector<8x32xbf16>, vector<32x32xbf16>, vector<8x32xf32> -> vector<8x32xf32>
    %c0_31 = arith.constant 0 : index
    %c0_32 = arith.constant 0 : index
    %c0_33 = arith.constant 0 : index
    %49 = vector.load %arg10[%c0_31, %c0_32, %c0_33] : memref<1x1x32xf32, #tpu.memory_space<vmem>>, vector<1x1x32xf32>
    %50 = vector.shape_cast %49 : vector<1x1x32xf32> to vector<1x32xf32>
    %51 = vector.broadcast %50 : vector<1x32xf32> to vector<8x32xf32>
    %52 = arith.addf %48, %51 : vector<8x32xf32>
    %53 = vector.shape_cast %38 : vector<8x32xf32> to vector<8x4x8xf32>
    %54 = tpu.transpose %53, [1, 0, 2] : vector<8x4x8xf32> -> vector<4x8x8xf32>
    %55 = vector.shape_cast %45 : vector<8x32xf32> to vector<8x4x8xf32>
    %56 = tpu.transpose %55, [1, 0, 2] : vector<8x4x8xf32> -> vector<4x8x8xf32>
    %57 = vector.shape_cast %52 : vector<8x32xf32> to vector<8x4x8xf32>
    %58 = tpu.transpose %57, [1, 0, 2] : vector<8x4x8xf32> -> vector<4x8x8xf32>
    %59 = arith.truncf %54 : vector<4x8x8xf32> to vector<4x8x8xbf16>
    %60 = arith.truncf %56 : vector<4x8x8xf32> to vector<4x8x8xbf16>
    "tpu.trace_start"() <{level = 10 : i32, message = "hqd,hkd->hqk"}> : () -> ()
    %cst_34 = arith.constant dense<0.000000e+00> : vector<4x8x8xf32>
    %61 = tpu.matmul %59, %60, %cst_34 {dimension_numbers = #tpu.dot_dimension_numbers<[2], [2], [1], [1], [0, 0, 0, 1, 1, 1], [0], [0]>} : vector<4x8x8xbf16>, vector<4x8x8xbf16>, vector<4x8x8xf32> -> vector<4x8x8xf32>
    "tpu.trace_stop"() : () -> ()
    %cst_35 = arith.constant 0.353553385 : f32
    %62 = vector.broadcast %cst_35 : f32 to vector<4x8x8xf32>
    %63 = arith.mulf %61, %62 : vector<4x8x8xf32>
    %64 = tpu.iota {dimensions = array<i32: 0>} : vector<8x8xi32>
    %65 = tpu.iota {dimensions = array<i32: 1>} : vector<8x8xi32>
    %66 = arith.cmpi sge, %64, %65 : vector<8x8xi32>
    %67 = vector.shape_cast %66 : vector<8x8xi1> to vector<1x8x8xi1>
    %cst_36 = arith.constant 0xFF800000 : f32
    %68 = vector.shape_cast %67 : vector<1x8x8xi1> to vector<1x8x8xi1>
    %69 = vector.broadcast %68 : vector<1x8x8xi1> to vector<4x8x8xi1>
    %70 = vector.broadcast %cst_36 : f32 to vector<4x8x8xf32>
    %71 = arith.select %69, %63, %70 : vector<4x8x8xi1>, vector<4x8x8xf32>
    %cst_37 = arith.constant dense<0xFF800000> : vector<4x8xf32>
    %72 = vector.multi_reduction <maximumf>, %71, %cst_37 [2] : vector<4x8x8xf32> to vector<4x8xf32>
    %73 = vector.shape_cast %72 : vector<4x8xf32> to vector<4x8x1xf32>
    %74 = vector.broadcast %73 : vector<4x8x1xf32> to vector<4x8x8xf32>
    %75 = arith.subf %71, %74 : vector<4x8x8xf32>
    %76 = math.exp %75 : vector<4x8x8xf32>
    %cst_38 = arith.constant dense<0.000000e+00> : vector<4x8xf32>
    %77 = vector.multi_reduction <add>, %76, %cst_38 [2] : vector<4x8x8xf32> to vector<4x8xf32>
    %78 = vector.shape_cast %77 : vector<4x8xf32> to vector<4x8x1xf32>
    %79 = tpu.reciprocal %78 {approx = true} : vector<4x8x1xf32> -> vector<4x8x1xf32>
    %80 = vector.broadcast %79 : vector<4x8x1xf32> to vector<4x8x8xf32>
    %81 = arith.mulf %76, %80 : vector<4x8x8xf32>
    %82 = arith.truncf %81 : vector<4x8x8xf32> to vector<4x8x8xbf16>
    %83 = arith.truncf %58 : vector<4x8x8xf32> to vector<4x8x8xbf16>
    "tpu.trace_start"() <{level = 10 : i32, message = "hqk,hkd->hqd"}> : () -> ()
    %cst_39 = arith.constant dense<0.000000e+00> : vector<4x8x8xf32>
    %84 = tpu.matmul %82, %83, %cst_39 {dimension_numbers = #tpu.dot_dimension_numbers<[2], [1], [1], [2], [0, 0, 0, 1, 1, 2], [0], [0]>} : vector<4x8x8xbf16>, vector<4x8x8xbf16>, vector<4x8x8xf32> -> vector<4x8x8xf32>
    "tpu.trace_stop"() : () -> ()
    %85 = tpu.transpose %84, [1, 0, 2] : vector<4x8x8xf32> -> vector<8x4x8xf32>
    %86 = vector.shape_cast %85 : vector<8x4x8xf32> to vector<8x32xf32>
    %87 = arith.truncf %86 : vector<8x32xf32> to vector<8x32xbf16>
    %c0_40 = arith.constant 0 : index
    %c0_41 = arith.constant 0 : index
    %c0_42 = arith.constant 0 : index
    %88 = vector.load %arg11[%c0_40, %c0_41, %c0_42] : memref<1x32x32xbf16, #tpu.memory_space<vmem>>, vector<1x32x32xbf16>
    %89 = vector.shape_cast %88 : vector<1x32x32xbf16> to vector<32x32xbf16>
    %cst_43 = arith.constant dense<0.000000e+00> : vector<8x32xf32>
    %90 = tpu.matmul %87, %89, %cst_43 {dimension_numbers = #tpu.dot_dimension_numbers<[1], [0], [0], [1], [0, 0, 1, 1], [], []>} : vector<8x32xbf16>, vector<32x32xbf16>, vector<8x32xf32> -> vector<8x32xf32>
    %c0_44 = arith.constant 0 : index
    %c0_45 = arith.constant 0 : index
    %c0_46 = arith.constant 0 : index
    %91 = vector.load %arg12[%c0_44, %c0_45, %c0_46] : memref<1x1x32xf32, #tpu.memory_space<vmem>>, vector<1x1x32xf32>
    %92 = vector.shape_cast %91 : vector<1x1x32xf32> to vector<1x32xf32>
    %93 = vector.broadcast %92 : vector<1x32xf32> to vector<8x32xf32>
    %94 = arith.addf %90, %93 : vector<8x32xf32>
    %95 = arith.addf %4, %94 : vector<8x32xf32>
    %c0_47 = arith.constant 0 : index
    %c0_48 = arith.constant 0 : index
    %c0_49 = arith.constant 0 : index
    %96 = vector.load %arg13[%c0_47, %c0_48, %c0_49] : memref<1x1x32xf32, #tpu.memory_space<vmem>>, vector<1x1x32xf32>
    %97 = vector.shape_cast %96 : vector<1x1x32xf32> to vector<1x32xf32>
    %c0_50 = arith.constant 0 : index
    %c0_51 = arith.constant 0 : index
    %c0_52 = arith.constant 0 : index
    %98 = vector.load %arg14[%c0_50, %c0_51, %c0_52] : memref<1x1x32xf32, #tpu.memory_space<vmem>>, vector<1x1x32xf32>
    %99 = vector.shape_cast %98 : vector<1x1x32xf32> to vector<1x32xf32>
    %cst_53 = arith.constant dense<0.000000e+00> : vector<8xf32>
    %100 = vector.multi_reduction <add>, %95, %cst_53 [1] : vector<8x32xf32> to vector<8xf32>
    %101 = vector.shape_cast %100 : vector<8xf32> to vector<8x1xf32>
    %cst_54 = arith.constant 3.200000e+01 : f32
    %102 = vector.broadcast %cst_54 : f32 to vector<8x1xf32>
    %103 = arith.divf %101, %102 : vector<8x1xf32>
    %104 = vector.broadcast %103 : vector<8x1xf32> to vector<8x32xf32>
    %105 = arith.subf %95, %104 : vector<8x32xf32>
    %106 = arith.mulf %105, %105 : vector<8x32xf32>
    %cst_55 = arith.constant dense<0.000000e+00> : vector<8xf32>
    %107 = vector.multi_reduction <add>, %106, %cst_55 [1] : vector<8x32xf32> to vector<8xf32>
    %108 = vector.shape_cast %107 : vector<8xf32> to vector<8x1xf32>
    %cst_56 = arith.constant 3.200000e+01 : f32
    %109 = vector.broadcast %cst_56 : f32 to vector<8x1xf32>
    %110 = arith.divf %108, %109 : vector<8x1xf32>
    %111 = vector.broadcast %103 : vector<8x1xf32> to vector<8x32xf32>
    %112 = arith.subf %95, %111 : vector<8x32xf32>
    %cst_57 = arith.constant 9.99999974E-6 : f32
    %113 = vector.broadcast %cst_57 : f32 to vector<8x1xf32>
    %114 = arith.addf %110, %113 : vector<8x1xf32>
    %115 = math.rsqrt %114 : vector<8x1xf32>
    %116 = vector.broadcast %115 : vector<8x1xf32> to vector<8x32xf32>
    %117 = arith.mulf %112, %116 : vector<8x32xf32>
    %118 = vector.broadcast %97 : vector<1x32xf32> to vector<8x32xf32>
    %119 = arith.mulf %117, %118 : vector<8x32xf32>
    %120 = vector.broadcast %99 : vector<1x32xf32> to vector<8x32xf32>
    %121 = arith.addf %119, %120 : vector<8x32xf32>
    %122 = arith.truncf %121 : vector<8x32xf32> to vector<8x32xbf16>
    %c0_58 = arith.constant 0 : index
    %c0_59 = arith.constant 0 : index
    %c0_60 = arith.constant 0 : index
    %123 = vector.load %arg15[%c0_58, %c0_59, %c0_60] : memref<1x32x128xbf16, #tpu.memory_space<vmem>>, vector<1x32x128xbf16>
    %124 = vector.shape_cast %123 : vector<1x32x128xbf16> to vector<32x128xbf16>
    %cst_61 = arith.constant dense<0.000000e+00> : vector<8x128xf32>
    %125 = tpu.matmul %122, %124, %cst_61 {dimension_numbers = #tpu.dot_dimension_numbers<[1], [0], [0], [1], [0, 0, 1, 1], [], []>} : vector<8x32xbf16>, vector<32x128xbf16>, vector<8x128xf32> -> vector<8x128xf32>
    %c0_62 = arith.constant 0 : index
    %c0_63 = arith.constant 0 : index
    %c0_64 = arith.constant 0 : index
    %126 = vector.load %arg16[%c0_62, %c0_63, %c0_64] : memref<1x1x128xf32, #tpu.memory_space<vmem>>, vector<1x1x128xf32>
    %127 = vector.shape_cast %126 : vector<1x1x128xf32> to vector<1x128xf32>
    %128 = vector.broadcast %127 : vector<1x128xf32> to vector<8x128xf32>
    %129 = arith.addf %125, %128 : vector<8x128xf32>
    %cst_65 = arith.constant 5.000000e-01 : f32
    %130 = vector.broadcast %cst_65 : f32 to vector<8x128xf32>
    %131 = arith.mulf %130, %129 : vector<8x128xf32>
    %cst_66 = arith.constant 4.471500e-02 : f32
    %132 = vector.broadcast %cst_66 : f32 to vector<8x128xf32>
    %133 = arith.mulf %132, %129 : vector<8x128xf32>
    %134 = arith.mulf %133, %129 : vector<8x128xf32>
    %135 = arith.mulf %134, %129 : vector<8x128xf32>
    %136 = arith.addf %129, %135 : vector<8x128xf32>
    %cst_67 = arith.constant 0.797884583 : f32
    %137 = vector.broadcast %cst_67 : f32 to vector<8x128xf32>
    %138 = arith.mulf %137, %136 : vector<8x128xf32>
    %139 = math.tanh %138 : vector<8x128xf32>
    %cst_68 = arith.constant 1.000000e+00 : f32
    %140 = vector.broadcast %cst_68 : f32 to vector<8x128xf32>
    %141 = arith.addf %140, %139 : vector<8x128xf32>
    %142 = arith.mulf %131, %141 : vector<8x128xf32>
    %143 = arith.truncf %142 : vector<8x128xf32> to vector<8x128xbf16>
    %c0_69 = arith.constant 0 : index
    %c0_70 = arith.constant 0 : index
    %c0_71 = arith.constant 0 : index
    %144 = vector.load %arg17[%c0_69, %c0_70, %c0_71] : memref<1x128x32xbf16, #tpu.memory_space<vmem>>, vector<1x128x32xbf16>
    %145 = vector.shape_cast %144 : vector<1x128x32xbf16> to vector<128x32xbf16>
    %cst_72 = arith.constant dense<0.000000e+00> : vector<8x32xf32>
    %146 = tpu.matmul %143, %145, %cst_72 {dimension_numbers = #tpu.dot_dimension_numbers<[1], [0], [0], [1], [0, 0, 1, 1], [], []>} : vector<8x128xbf16>, vector<128x32xbf16>, vector<8x32xf32> -> vector<8x32xf32>
    %c0_73 = arith.constant 0 : index
    %c0_74 = arith.constant 0 : index
    %c0_75 = arith.constant 0 : index
    %147 = vector.load %arg18[%c0_73, %c0_74, %c0_75] : memref<1x1x32xf32, #tpu.memory_space<vmem>>, vector<1x1x32xf32>
    %148 = vector.shape_cast %147 : vector<1x1x32xf32> to vector<1x32xf32>
    %149 = vector.broadcast %148 : vector<1x32xf32> to vector<8x32xf32>
    %150 = arith.addf %146, %149 : vector<8x32xf32>
    %151 = arith.addf %95, %150 : vector<8x32xf32>
    %152 = vector.shape_cast %151 : vector<8x32xf32> to vector<1x8x32xf32>
    %c0_76 = arith.constant 0 : index
    %c0_77 = arith.constant 0 : index
    %c0_78 = arith.constant 0 : index
    %153 = vector.load %arg19[%c0_76, %c0_77, %c0_78] : memref<1x8x32xf32, #tpu.memory_space<vmem>>, vector<1x8x32xf32>
    tpu.vector_store %arg19[%c0_76, %c0_77, %c0_78], %152 {strides = array<i32>} : memref<1x8x32xf32, #tpu.memory_space<vmem>>, vector<1x8x32xf32>,
    return
  }
  func.func @transform_0(%arg0: i32, %arg1: i32) -> (i32, i32, i32) {
    %c0_i32 = arith.constant 0 : i32
    %c0_i32_0 = arith.constant 0 : i32
    %c0_i32_1 = arith.constant 0 : i32
    return %arg0, %c0_i32, %c0_i32_0 : i32, i32, i32
  }
  func.func @transform_1(%arg0: i32, %arg1: i32) -> (i32, i32, i32) {
    %c0_i32 = arith.constant 0 : i32
    %c0_i32_0 = arith.constant 0 : i32
    %c0_i32_1 = arith.constant 0 : i32
    return %arg1, %c0_i32, %c0_i32_0 : i32, i32, i32
  }
  func.func @transform_2(%arg0: i32, %arg1: i32) -> (i32, i32, i32) {
    %c0_i32 = arith.constant 0 : i32
    %c0_i32_0 = arith.constant 0 : i32
    %c0_i32_1 = arith.constant 0 : i32
    return %arg1, %c0_i32, %c0_i32_0 : i32, i32, i32
  }
  func.func @transform_3(%arg0: i32, %arg1: i32) -> (i32, i32, i32) {
    %c0_i32 = arith.constant 0 : i32
    %c0_i32_0 = arith.constant 0 : i32
    %c0_i32_1 = arith.constant 0 : i32
    return %arg1, %c0_i32, %c0_i32_0 : i32, i32, i32
  }
  func.func @transform_4(%arg0: i32, %arg1: i32) -> (i32, i32, i32) {
    %c0_i32 = arith.constant 0 : i32
    %c0_i32_0 = arith.constant 0 : i32
    %c0_i32_1 = arith.constant 0 : i32
    return %arg1, %c0_i32, %c0_i32_0 : i32, i32, i32
  }
  func.func @transform_5(%arg0: i32, %arg1: i32) -> (i32, i32, i32) {
    %c0_i32 = arith.constant 0 : i32
    %c0_i32_0 = arith.constant 0 : i32
    %c0_i32_1 = arith.constant 0 : i32
    return %arg1, %c0_i32, %c0_i32_0 : i32, i32, i32
  }
  func.func @transform_6(%arg0: i32, %arg1: i32) -> (i32, i32, i32) {
    %c0_i32 = arith.constant 0 : i32
    %c0_i32_0 = arith.constant 0 : i32
    %c0_i32_1 = arith.constant 0 : i32
    return %arg1, %c0_i32, %c0_i32_0 : i32, i32, i32
  }
  func.func @transform_7(%arg0: i32, %arg1: i32) -> (i32, i32, i32) {
    %c0_i32 = arith.constant 0 : i32
    %c0_i32_0 = arith.constant 0 : i32
    %c0_i32_1 = arith.constant 0 : i32
    return %arg1, %c0_i32, %c0_i32_0 : i32, i32, i32
  }
  func.func @transform_8(%arg0: i32, %arg1: i32) -> (i32, i32, i32) {
    %c0_i32 = arith.constant 0 : i32
    %c0_i32_0 = arith.constant 0 : i32
    %c0_i32_1 = arith.constant 0 : i32
    return %arg1, %c0_i32, %c0_i32_0 : i32, i32, i32
  }
  func.func @transform_9(%arg0: i32, %arg1: i32) -> (i32, i32, i32) {
    %c0_i32 = arith.constant 0 : i32
    %c0_i32_0 = arith.constant 0 : i32
    %c0_i32_1 = arith.constant 0 : i32
    return %arg1, %c0_i32, %c0_i32_0 : i32, i32, i32
  }
  func.func @transform_10(%arg0: i32, %arg1: i32) -> (i32, i32, i32) {
    %c0_i32 = arith.constant 0 : i32
    %c0_i32_0 = arith.constant 0 : i32
    %c0_i32_1 = arith.constant 0 : i32
    return %arg1, %c0_i32, %c0_i32_0 : i32, i32, i32
  }
  func.func @transform_11(%arg0: i32, %arg1: i32) -> (i32, i32, i32) {
    %c0_i32 = arith.constant 0 : i32
    %c0_i32_0 = arith.constant 0 : i32
    %c0_i32_1 = arith.constant 0 : i32
    return %arg1, %c0_i32, %c0_i32_0 : i32, i32, i32
  }
  func.func @transform_12(%arg0: i32, %arg1: i32) -> (i32, i32, i32) {
    %c0_i32 = arith.constant 0 : i32
    %c0_i32_0 = arith.constant 0 : i32
    %c0_i32_1 = arith.constant 0 : i32
    return %arg1, %c0_i32, %c0_i32_0 : i32, i32, i32
  }
  func.func @transform_13(%arg0: i32, %arg1: i32) -> (i32, i32, i32) {
    %c0_i32 = arith.constant 0 : i32
    %c0_i32_0 = arith.constant 0 : i32
    %c0_i32_1 = arith.constant 0 : i32
    return %arg1, %c0_i32, %c0_i32_0 : i32, i32, i32
  }
  func.func @transform_14(%arg0: i32, %arg1: i32) -> (i32, i32, i32) {
    %c0_i32 = arith.constant 0 : i32
    %c0_i32_0 = arith.constant 0 : i32
    %c0_i32_1 = arith.constant 0 : i32
    return %arg1, %c0_i32, %c0_i32_0 : i32, i32, i32
  }
  func.func @transform_15(%arg0: i32, %arg1: i32) -> (i32, i32, i32) {
    %c0_i32 = arith.constant 0 : i32
    %c0_i32_0 = arith.constant 0 : i32
    %c0_i32_1 = arith.constant 0 : i32
    return %arg1, %c0_i32, %c0_i32_0 : i32, i32, i32
  }
  func.func @transform_16(%arg0: i32, %arg1: i32) -> (i32, i32, i32) {
    %c0_i32 = arith.constant 0 : i32
    %c0_i32_0 = arith.constant 0 : i32
    %c0_i32_1 = arith.constant 0 : i32
    return %arg1, %c0_i32, %c0_i32_0 : i32, i32, i32
  }
  func.func @transform_17(%arg0: i32, %arg1: i32) -> (i32, i32, i32) {
    %c0_i32 = arith.constant 0 : i32
    %c0_i32_0 = arith.constant 0 : i32
    %c0_i32_1 = arith.constant 0 : i32
    return %arg0, %c0_i32, %c0_i32_0 : i32, i32, i32
  }
}

</mosaic_0001>

<bundles_post_ra>
// kernel: transformer_forward.3
= control target key start
LH: loop header
LB: loop body
LE: loop exit
PB: predicated region body
PF: predicated region fallthrough
CT: control target
= control target key end

     0   :  { %9 = vsyncpa [#allocation3], 0  ;;  %s738_s0 = inlined_call_operand.vmem [shape: f32[16,32], index: 0, kind: input, shape index: {}]   ;;  %s739_s1 = inlined_call_operand.vmem [shape: f32[1,32], index: 1, kind: input, shape index: {}]   ;;  %s740_s2 = inlined_call_operand.vmem [shape: f32[1,32], index: 2, kind: input, shape index: {}]   ;;  %s741_s3 = inlined_call_operand.vmem [shape: bf16[32,64], index: 3, kind: input, shape index: {}]   ;;  %s742_s4 = inlined_call_operand.hbm [shape: f32[16,64], index: 4, kind: output, shape index: {}]  }
   0x1   :  { %11 = vsyncpa [#allocation3 + $0x1], 0  ;;  %s612_s15 = smov 0   ;;  %s614_s16 = smov 0  }
   0x2   :  { %s616_s17 = smov 0   ;;  %s618_s18 = smov 0  }
   0x3   :  { %s620_s19 = smov 0   ;;  %s622_s20 = smov 0  }
   0x4 LB: > { %s417_s21 = sadd.s32 4294967295, %s582_s20   ;;  %s418_s22 = sadd.s32 4294967294, %s582_s20   ;;  %s582_s20 = sphi %s622_s20, %s17_s20   ;;  %s578_s19 = sphi %s620_s19, %s749_s19   ;;  %s574_s18 = sphi %s618_s18, %s748_s18   ;;  %s570_s17 = sphi %s616_s17, %s747_s17   ;;  %s566_s16 = sphi %s614_s16, %s746_s16   ;;  %s562_s15 = sphi %s612_s15, %s745_s15  }
   0x5   : > { %s29_s23 = sadd.s32 1, %s578_s19  ;;  %s132_s24 = sadd.s32 1, %s570_s17 }
   0x6   : > { %p31_p0 = scmp.ge.s32.totalorder %s29_s23, 2  ;;  %p142_p1 = scmp.ne.s32.totalorder %s570_s17, %s566_s16 }
   0x7   : > { %p143_p2 = scmp.eq.s32.totalorder %s417_s21, 1  ;;  %p148_p3 = scmp.ne.s32.totalorder %s566_s16, %s562_s15 }
   0x8   : > { %s751_s23 = smov (%p31_p0, %s29_s23), 0  ;;  %p149_p5 = scmp.eq.s32.totalorder %s418_s22, 1 }
   0x9   : > { %p652_p4 = por %p143_p2, %p142_p1  ;;  %s127_s26 = ssub.s32 %s578_s19, %s751_s23 }
   0xa   : > { %p422_p6 = scmp.ge.s32.totalorder %s582_s20, 1  ;;  %p130_p7 = scmp.eq.s32.totalorder %s127_s26, 0 }
   0xb   : > { %p659_p8 = por %p149_p5, %p148_p3  ;;  %p187_p9 = scmp.lt.s32.totalorder %s582_s20, 3 }
   0xc   : > { %s665_s28 = scalar_select %p130_p7, %s570_s17, %s132_s24  }
   0xd   : > { %p188_p10 = pnand %p422_p6, %p187_p9 }
   0xe   : > { %p216_p11 = scmp.lt.s32.totalorder (!%p188_p10), %s574_s18, 1  ;;  %s213_s22 = sand.u32 (!%p188_p10), 1, %s566_s16  }
   0xf   : > { %191 = sbr.rel (%p188_p10) target bundleno = 544 (0x220), region = 36  ;;  %s423_s24 = sshll.u32 (!%p188_p10), %s213_s22, 3 }
  0x10   : > { %s431_s26 = sshll.u32 (!%p188_p10), %s574_s18, 7  ;;  %s320_s8 = scalar_lea.sflag (!%p188_p10), [#allocation3], %s213_s22 }
  0x14   : > { %s217_s29 = scalar_select %p216_p11, %s574_s18, 1  ;;  %vm228_vm0 = vcmask 261120   ;;  %v502_v7 = vld [vmem:[%s741_s3 + $0x8] sm:$0xff]   ;;  %v584_v8 = vmov 0.0   ;;  %vm585_vm1 = vmmov 0   ;;  %v503_v9 = vld [vmem:[%s741_s3] sm:$0xff]  }
  0x15   : > { %437 = vmatprep.subr.bf16.mxu0 %v584_v8  ;;  %441 = vmatprep.mubr.msk.bf16.mxu0 %vm585_vm1, %v584_v8  ;;  %v425_v14 = vld [vmem:[%s739_s1] ss:$0 sm:$0xff]  ;;  %vm317_vm2 = vcmask 523264   ;;  %s586_s18 = smov [#allocation2]  }
  0x16   : > { %s424_s30 = sshll.u32 %s217_s29, 3  ;;  %438 = vmatpush3.bf16.msra.mxu0 %v502_v7  ;;  %v426_v16 = vld [vmem:[%s740_s2] ss:$0 sm:$0xff]  ;;  %s215_s29 = scalar_lea.vmem [#allocation2], %s423_s24 }
  0x17   : > { %s219_s7 = scalar_lea.vmem %s738_s0, %s424_s30  ;;  %439 = vmatprep.subr.bf16.mxu0 %v584_v8  ;;  %s334_s30 = sshll.u32 %s215_s29, 4  ;;  %s694_s30 = int_to_ptr.vmem [resolvable:$true] %s334_s30 }
  0x18   : > { %v225_v0 = vld [vmem:[%s219_s7] sm:$0xff]  ;;  %s692_s7 = scalar_lea.hbm %s742_s4, %s431_s26  ;;  %s506_s9 = scalar_lea.vmem %s694_s30, 128 }
  0x19   : > { %v229_v1 = vsel %vm228_vm0, %v225_v0, 0.0  ;;  %p507_p12 = scmp.ne.s32.totalorder %s694_s30, %s506_s9  ;;  %s510_s10 = sshll.u32 %s586_s18, 4  ;;  %s511_s10 = int_to_ptr.vmem [resolvable:$false] %s510_s10 }
  0x1a   : > { %230 = vadd.xlane.f32.xlu0 %v229_v1  ;;  %440 = vmatpush3.bf16.msra.mxu0 %v503_v9  ;;  %s512_s11 = scalar_lea.vmem %s511_s10, 256  ;;  %p513_p1 = scmp.lt.s32.totalorder %s694_s30, %s511_s10 }
  0x1b   : > { %p508_p13 = pnand %p507_p12, %p652_p4  ;;  %p514_p2 = scmp.lt.s32.totalorder %s512_s11, %s506_s9 }
  0x1d   : > { %p509_p0 = pneg %p508_p13  ;;  %p515_p3 = por %p514_p2, %p513_p1 }
  0x1f   : > { %p516_p5 = pnand %p515_p3, %p509_p0 }
  0xa3   : > { %v231_v2 = vpop.xlane.xlu0 %230 }
  0xa4   : > { %v233_v3 = vmul.f32 0.03125, %v231_v2 }
  0xa6   : > { %v234_v4 = vsub.f32 %v225_v0, %v233_v3 }
  0xa8   : > { %v235_v5 = vmul.f32 %v234_v4, %v234_v4 }
  0xaa   : > { %v236_v6 = vsel %vm228_vm0, %v235_v5, 0.0 }
  0xab   : > { %237 = vadd.xlane.f32.xlu0 %v236_v6 }
 0x134   : > { %v238_v10 = vpop.xlane.xlu0 %237 }
 0x135   : > { %v239_v11 = vmul.f32 0.03125, %v238_v10 }
 0x137   : > { %v240_v12 = vadd.f32 1e-05, %v239_v11 }
 0x139   : > { %504 = vrsqrt.f32 %v240_v12 }
 0x146   : > { %v505_v13 = vpop.eup %504 }
 0x147   : > { %v242_v15 = vmul.f32 %v505_v13, %v234_v4 }
 0x149   : > { %v249_v17 = vmul.f32 %v425_v14, %v242_v15 }
 0x14b   : > { %v256_v18 = vadd.f32 %v426_v16, %v249_v17 }
 0x14d   : > { %v257_v19 = vpack.c.bf16 %v256_v18, %v256_v18 }
 0x14f   : > { %442 = vmatmul.mubr.msk.bf16.vlgmr.msra.gmra.mxu0 %vm228_vm0, %v257_v19 }
 0x20f   : > { %v311_v20 = vpop.f32.mrf.mxu0 }
 0x210   : > { %318 = vst.msk [vmem:[%s215_s29] sm:$0xff] %vm317_vm2, %v311_v20 }
 0x211   : > { %v443_v21 = vpop.f32.mrf.mxu0 }
 0x212   : > { %519 = shalt.err (!%p516_p5)
}
 0x213   : > { %s520_s12 = scalar_lea.hbm %s692_s7, 128  ;;  %s524_s21 = scalar_lea.hbm %s742_s4, 256 }
 0x214   : > { %p521_p6 = scmp.ne.s32.totalorder %s692_s7, %s520_s12  ;;  %p525_p10 = scmp.lt.s32.totalorder %s692_s7, %s742_s4 }
 0x215   : > { %p526_p11 = scmp.lt.s32.totalorder %s524_s21, %s520_s12 }
 0x216   : > { %p522_p7 = pnand %p521_p6, %p652_p4 }
 0x217   : > { %p527_p12 = por %p526_p11, %p525_p10 }
 0x218   : > { %p523_p9 = pneg %p522_p7 }
 0x21a   : > { %p528_p13 = pnand %p527_p12, %p523_p9 }
 0x21c   : > { %531 = shalt.err (!%p528_p13)
}
 0x21d   : > { %445 = dma.vmem_to_hbm [thread:$0]  (%p652_p4), %s694_s30, 128, %s692_s7, %s320_s8   ;;  %v314_v22 = vpop.f32.mrf.mxu0 }
 0x21f   : > { %v444_v23 = vpop.f32.mrf.mxu0 }
 0x220 PF: > { %p451_p0 = scmp.ge.s32.totalorder %s582_s20, 2  ;;  %s346_s26 = sand.u32 1, %s562_s15  }
 0x221   : > { %s347_s29 = scalar_lea.sflag [#allocation3], %s346_s26 }
 0x222   : > { %p448_p1 = pnand %p451_p0, %p659_p8 }
 0x224   : > { %p449_p2 = pneg %p448_p1 }
 0x226   : > { %557 = dma.done.wait (%p449_p2), %s347_s29, 128  }
 0x227   : > { %559 = vsyncadd (%p449_p2), %s347_s29, 4294967168  ;;  %s17_s20 = sadd.s32 1, %s582_s20   ;;  %s745_s15 = smov %s566_s16 }
 0x228   : > { %p14_p3 = scmp.ge.s32.totalorder %s17_s20, 4   ;;  %s746_s16 = smov %s570_s17 }
 0x229   : > { %s747_s17 = smov %s665_s28  ;;  %s748_s18 = smov %s578_s19 }
 0x22a   : > { %s749_s19 = smov %s751_s23  ;;  %16 = sbr.rel (!%p14_p3) target bundleno = 4 (0x4), region = 74 }
 0x22f   :  { %352 = vsyncpa [#allocation3], 1 }
 0x230   :  { %354 = vsyncpa [#allocation3 + $0x1], 1 }

// kernel: transformer_forward.2
= control target key start
LH: loop header
LB: loop body
LE: loop exit
PB: predicated region body
PF: predicated region fallthrough
CT: control target
= control target key end

     0   :  { %s3053_s24 = smov 0   ;;  %s3055_s25 = smov 0   ;;  %s3466_s0 = inlined_call_operand.vmem [shape: f32[2,8,32], index: 0, kind: input, shape index: {}]   ;;  %s3467_s1 = inlined_call_operand.vmem [shape: f32[2,1,32], index: 1, kind: input, shape index: {}]   ;;  %s3468_s2 = inlined_call_operand.vmem [shape: f32[2,1,32], index: 2, kind: input, shape index: {}]   ;;  %s3469_s3 = inlined_call_operand.vmem [shape: bf16[2,32,32], index: 3, kind: input, shape index: {}]   ;;  %s3470_s4 = inlined_call_operand.vmem [shape: f32[2,1,32], index: 4, kind: input, shape index: {}]   ;;  %s3471_s5 = inlined_call_operand.vmem [shape: bf16[2,32,32], index: 5, kind: input, shape index: {}]   ;;  %s3472_s6 = inlined_call_operand.vmem [shape: f32[2,1,32], index: 6, kind: input, shape index: {}]   ;;  %s3473_s7 = inlined_call_operand.vmem [shape: bf16[2,32,32], index: 7, kind: input, shape index: {}]   ;;  %s3474_s8 = inlined_call_operand.vmem [shape: f32[2,1,32], index: 8, kind: input, shape index: {}]   ;;  %s3475_s9 = inlined_call_operand.vmem [shape: bf16[2,32,32], index: 9, kind: input, shape index: {}]   ;;  %s3476_s10 = inlined_call_operand.vmem [shape: f32[2,1,32], index: 10, kind: input, shape index: {}]   ;;  %s3477_s11 = inlined_call_operand.vmem [shape: f32[2,1,32], index: 11, kind: input, shape index: {}]   ;;  %s3478_s12 = inlined_call_operand.vmem [shape: f32[2,1,32], index: 12, kind: input, shape index: {}]   ;;  %s3479_s13 = inlined_call_operand.vmem [shape: bf16[2,32,128], index: 13, kind: input, shape index: {}]   ;;  %s3480_s14 = inlined_call_operand.vmem [shape: f32[2,1,128], index: 14, kind: input, shape index: {}]   ;;  %s3481_s15 = inlined_call_operand.vmem [shape: bf16[2,128,32], index: 15, kind: input, shape index: {}]   ;;  %s3482_s16 = inlined_call_operand.vmem [shape: f32[2,1,32], index: 16, kind: input, shape index: {}]   ;;  %s3483_s17 = inlined_call_operand.vmem [shape: f32[2,8,32], index: 17, kind: output, shape index: {}]  }
   0x1   :  { %3489 = sst [smem:[#allocation9_spill]] %s3466_s0  ;;  %s3057_s26 = smov 0  }
   0x2   :  { %3490 = sst [smem:[#allocation10_spill]] %s3467_s1  ;;  %s3059_s27 = smov 0  }
   0x3   :  { %3491 = sst [smem:[#allocation11_spill]] %s3469_s3  ;;  %s3061_s28 = smov 0  }
   0x4   :  { %3492 = sst [smem:[#allocation12_spill]] %s3470_s4 }
   0x5   :  { %3493 = sst [smem:[#allocation13_spill]] %s3471_s5 }
   0x6   :  { %3494 = sst [smem:[#allocation14_spill]] %s3473_s7 }
   0x7   :  { %3495 = sst [smem:[#allocation15_spill]] %s3475_s9 }
   0x8   :  { %3496 = sst [smem:[#allocation16_spill]] %s3476_s10 }
   0x9   :  { %3497 = sst [smem:[#allocation17_spill]] %s3477_s11 }
   0xa   :  { %3498 = sst [smem:[#allocation18_spill]] %s3480_s14 }
   0xb   :  { %3499 = sst [smem:[#allocation19_spill]] %s3481_s15 }
   0xc   :  { %3500 = sst [smem:[#allocation20_spill]] %s3482_s16 }
   0xd   :  { %3501 = sst [smem:[#allocation21_spill]] %s3483_s17 }
   0xe LB: > { %3502 = sst [smem:[#allocation2_spill]] %s2935_s24  ;;  %s36_s29 = sadd.s32 1, %s2943_s26  ;;  %s2951_s28 = sphi %s3061_s28, %s27_s28   ;;  %s2947_s27 = sphi %s3059_s27, %s3542_s27   ;;  %s2943_s26 = sphi %s3057_s26, %s3541_s26   ;;  %s2939_s25 = sphi %s3055_s25, %s3540_s25   ;;  %s2935_s24 = sphi %s3053_s24, %s3539_s24  }
   0xf   : > { %3503 = sst [smem:[#allocation3_spill]] %s2943_s26  ;;  %s39_s0 = sadd.s32 1, %s2947_s27 }
  0x10   : > { %3504 = sst [smem:[#allocation4_spill]] %s2947_s27  ;;  %p37_p0 = scmp.ge.s32.totalorder %s36_s29, 2 }
  0x11   : > { %3505 = sst [smem:[#allocation5_spill]] %s2951_s28  ;;  %p2602_p1 = scmp.ge.s32.totalorder %s2951_s28, 1 }
  0x12   : > { %p638_p2 = scmp.lt.s32.totalorder %s2951_s28, 5  ;;  %s3544_s29 = smov (%p37_p0, %s36_s29), 0 }
  0x13   : > { %3506 = sst [smem:[#allocation6_spill]] %s3544_s29  ;;  %s3546_s0 = smov (!%p37_p0, %s39_s0), %s2947_s27 }
  0x14   : > { %p639_p3 = pnand %p2602_p1, %p638_p2  ;;  %p41_p4 = scmp.ge.s32.totalorder %s3546_s0, 2 }
  0x16   : > { %s3548_s0 = smov (%p41_p4, %s3546_s0), 0  ;;  %642 = sbr.rel (%p639_p3) target bundleno = 2553 (0x9f9), region = 88 }
  0x17   : > { %3507 = sst [smem:[#allocation7_spill]] %s3548_s0 }
  0x1b   : > { %p748_p5 = scmp.lt.s32.totalorder %s2939_s25, 1  ;;  %p752_p6 = scmp.lt.s32.totalorder %s2935_s24, 1 }
  0x1c   : > { %s3508_s20 = sld [smem:[#allocation9_spill]] }
  0x1d   : > { %s3550_s25 = smov (!%p748_p5, %s2939_s25), 1  ;;  %s3510_s3 = sld [smem:[#allocation11_spill]] }
  0x1e   : > { %s3087_s30 = scalar_select %p752_p6, %s2935_s24, 1 }
  0x1f   : > { %s2603_s18 = sshll.u32 %s3550_s25, 3  ;;  %s3512_s5 = sld [smem:[#allocation13_spill]] }
  0x20   : > { %s2669_s24 = sshll.u32 %s3087_s30, 4  ;;  %s3513_s7 = sld [smem:[#allocation14_spill]] }
  0x21   : > { %s3514_s9 = sld [smem:[#allocation15_spill]]  ;;  %s3148_s17 = scalar_lea.vmem %s3479_s13, %s2669_s24 }
  0x22   : > { %s751_s21 = scalar_lea.vmem %s3508_s20, %s2603_s18  ;;  %s3520_s26 = sld [smem:[#allocation19_spill]] }
  0x23   : > { %s3104_s25 = scalar_lea.vmem %s3510_s3, %s2669_s24  ;;  %s3518_s3 = sld [smem:[#allocation18_spill]] }
  0x25   : > { %s3113_s22 = scalar_lea.vmem %s3512_s5, %s2669_s24  ;;  %s3519_s5 = sld [smem:[#allocation20_spill]] }
  0x26   : > { %s3122_s29 = scalar_lea.vmem %s3513_s7, %s2669_s24  ;;  %s3521_s7 = sld [smem:[#allocation21_spill]] }
  0x27   : > { %s3131_s1 = scalar_lea.vmem %s3514_s9, %s2669_s24  ;;  %s3522_s24 = sld [smem:[#allocation2_spill]] }
  0x28   : > { %3515 = sst [smem:[#allocation8_spill]] %s3131_s1  ;;  %s2674_s1 = sshll.u32 %s3087_s30, 6 }
  0x29   : > { %s803_s9 = scalar_lea.vmem %s3518_s3, %s3087_s30  ;;  %s3162_s11 = scalar_lea.vmem %s3520_s26, %s2674_s1 }
  0x2b   : > { %s811_s10 = scalar_lea.vmem %s3519_s5, %s3087_s30 }
  0x2c   : > { %s3167_s4 = scalar_lea.vmem %s3521_s7, %s2603_s18 }
  0x2d   : > { %p2617_p7 = scmp.ne.s32.totalorder %s3522_s24, 0 }
  0x2f   : > { %820 = sbr.rel (%p2617_p7) target bundleno = 54 (0x36), region = 92 }
  0x34   : > { %v821_v0 = vld [vmem:[%s751_s21] sm:$0xff]  ;;  %vm822_vm0 = vcmask 261120  }
  0x35   : > { %823 = vst.msk [vmem:[%s3167_s4] sm:$0xff] %vm822_vm0, %v821_v0 }
  0x36 PF: > { %vm827_vm1 = vcmask 261120   ;;  %v2873_v8 = vld [vmem:[%s3104_s25 + $0x8] sm:$0xff]   ;;  %v2953_v9 = vmov 0.0   ;;  %vm2954_vm2 = vmmov 0   ;;  %v2874_v10 = vld [vmem:[%s3104_s25] sm:$0xff]   ;;  %s3523_s7 = sld [smem:[#allocation10_spill]]  ;;  %s3525_s1 = scalar_lea.vmem %s3468_s2, %s3087_s30  ;;  %v1064_v43 = vlaneseq }
  0x37   : > { %2715 = vmatprep.subr.bf16.mxu0 %v2953_v9  ;;  %2719 = vmatprep.mubr.msk.bf16.mxu0 %vm2954_vm2, %v2953_v9  ;;  %v2619_v17 = vld [vmem:[%s3525_s1] ss:$0 sm:$0xff]  ;;  %v2875_v20 = vld [vmem:[%s3113_s22 + $0x8] sm:$0xff]   ;;  %s3526_s26 = scalar_lea.vmem %s3472_s6, %s3087_s30  ;;  %s2955_s15 = smov 104   ;;  %v2958_v41 = vmov 1983009808  }
  0x38   : > { %2716 = vmatpush3.bf16.msra.mxu0 %v2873_v8  ;;  %2739 = vmatprep.subr.bf16.mxu1 %v2953_v9  ;;  %v2876_v22 = vld [vmem:[%s3113_s22] sm:$0xff]   ;;  %v2877_v23 = vld [vmem:[%s3122_s29 + $0x8] sm:$0xff]   ;;  %s2956_s16 = smov 120   ;;  %s3527_s20 = sld [smem:[#allocation12_spill]]  ;;  %v1062_v42 = vunpack.c.l.s4 %v2958_v41  ;;  %v2959_v44 = vmov 1934713408  }
  0x39   : > { %2717 = vmatprep.subr.bf16.mxu0 %v2953_v9  ;;  %2741 = vmatprep.mubr.msk.bf16.mxu1 %vm2954_vm2, %v2953_v9  ;;  %v2878_v24 = vld [vmem:[%s3122_s29] sm:$0xff]   ;;  %s2957_s23 = smov 112   ;;  %v1094_v45 = vunpack.c.l.s4 %v2959_v44  ;;  %v3234_v47 = vshrl.u32 %v1064_v43, 7  ;;  %vm1495_vm3 = vcmask 64512   ;;  %s3529_s24 = scalar_lea.vmem %s3474_s8, %s3087_s30  ;;  %vm1750_vm5 = vcmask 1043456  }
  0x3a   : > { %v2624_v29 = vld [vmem:[%s3526_s26] ss:$0 sm:$0xff]  ;;  %v1063_v46 = vunpack.c.0.s8 %v1062_v42  ;;  %s3530_s3 = sld [smem:[#allocation8_spill]]  ;;  %s2960_s5 = smov 16   ;;  %vm2081_vm6 = vcmask 130048   ;;  %vm2083_vm7 = vcmask 195584  }
  0x3b   : > { %v1095_v50 = vunpack.c.0.s8 %v1094_v45  ;;  %s3531_s1 = sld [smem:[#allocation16_spill]] }
  0x3c   : > { %v3172_v1 = vld [vmem:[%s3167_s4] sm:$0xff]  ;;  %2718 = vmatpush3.bf16.msra.mxu0 %v2874_v10  ;;  %s3524_s18 = scalar_lea.vmem %s3523_s7, %s3087_s30  ;;  %v3237_v51 = vsub.s32 %v1063_v46, %v3234_v47  ;;  %s2961_s7 = smov 8  }
  0x3d   : > { %v828_v2 = vsel %vm827_vm1, %v3172_v1, 0.0  ;;  %2723 = vmatprep.subr.bf16.mxu0 %v2953_v9  ;;  %v2618_v15 = vld [vmem:[%s3524_s18] ss:$0 sm:$0xff]  ;;  %v3240_v57 = vsub.s32 %v1095_v50, %v3234_v47  ;;  %s2962_s18 = smov 24  }
  0x3e   : > { %829 = vadd.xlane.f32.xlu0 %v828_v2  ;;  %s3528_s0 = scalar_lea.vmem %s3527_s20, %s3087_s30 }
  0x3f   : > { %v2620_v34 = vld [vmem:[%s3528_s0] ss:$0 sm:$0xff] }
  0x41   : > { %s3532_s22 = scalar_lea.vmem %s3531_s1, %s3087_s30 }
  0xc7   : > { %v830_v3 = vpop.xlane.xlu0 %829 }
  0xc8   : > { %v832_v4 = vmul.f32 0.03125, %v830_v3 }
  0xca   : > { %v833_v5 = vsub.f32 %v3172_v1, %v832_v4 }
  0xcc   : > { %v834_v6 = vmul.f32 %v833_v5, %v833_v5 }
  0xce   : > { %v835_v7 = vsel %vm827_vm1, %v834_v6, 0.0 }
  0xcf   : > { %836 = vadd.xlane.f32.xlu0 %v835_v7 }
 0x158   : > { %v837_v11 = vpop.xlane.xlu0 %836 }
 0x159   : > { %v838_v12 = vmul.f32 0.03125, %v837_v11 }
 0x15b   : > { %v839_v13 = vadd.f32 1e-05, %v838_v12 }
 0x15d   : > { %2891 = vrsqrt.f32 %v839_v13 }
 0x16a   : > { %v2892_v14 = vpop.eup %2891 }
 0x16b   : > { %v841_v16 = vmul.f32 %v2892_v14, %v833_v5 }
 0x16d   : > { %v848_v18 = vmul.f32 %v2618_v15, %v841_v16 }
 0x16f   : > { %v855_v19 = vadd.f32 %v2619_v17, %v848_v18 }
 0x171   : > { %v856_v21 = vpack.c.bf16 %v855_v19, %v855_v19 }
 0x173   : > { %2720 = vmatmul.mubr.msk.bf16.vlgmr.msra.gmra.mxu0 %vm827_vm1, %v856_v21 }
 0x174   : > { %2724 = vmatpush3.bf16.msra.mxu0 %v2875_v20  ;;  %2727 = vmatprep.mubr.msk.bf16.mxu0 %vm2954_vm2, %v2953_v9 }
 0x175   : > { %2725 = vmatprep.subr.bf16.mxu0 %v2953_v9 }
 0x178   : > { %2726 = vmatpush3.bf16.msra.mxu0 %v2876_v22 }
 0x179   : > { %2731 = vmatprep.subr.bf16.mxu0 %v2953_v9 }
 0x17b   : > { %2728 = vmatmul.mubr.msk.bf16.vlgmr.msra.gmra.mxu0 %vm827_vm1, %v856_v21 }
 0x17c   : > { %2732 = vmatpush3.bf16.msra.mxu0 %v2877_v23  ;;  %2735 = vmatprep.mubr.msk.bf16.mxu0 %vm2954_vm2, %v2953_v9 }
 0x17d   : > { %2733 = vmatprep.subr.bf16.mxu0 %v2953_v9 }
 0x180   : > { %2734 = vmatpush3.bf16.msra.mxu0 %v2878_v24 }
 0x181   : > { %2745 = vmatprep.subr.bf16.mxu0 %v2953_v9 }
 0x183   : > { %2736 = vmatmul.mubr.msk.bf16.vlgmr.msra.gmra.mxu0 %vm827_vm1, %v856_v21 }
 0x184   : > { %2747 = vmatprep.mubr.msk.bf16.mxu0 %vm2954_vm2, %v2953_v9 }
 0x233   : > { %v917_v25 = vpop.f32.mrf.mxu0 }
 0x234   : > { %v918_v37 = vadd.f32 %v2620_v34, %v917_v25 }
 0x235   : > { %v2721_v26 = vpop.f32.mrf.mxu0 }
 0x237   : > { %v920_v27 = vpop.f32.mrf.mxu0 }
 0x239   : > { %v2722_v28 = vpop.f32.mrf.mxu0 }
 0x23b   : > { %v980_v30 = vpop.f32.mrf.mxu0 }
 0x23c   : > { %v981_v31 = vadd.f32 %v2624_v29, %v980_v30 }
 0x23d   : > { %v2729_v32 = vpop.f32.mrf.mxu0 }
 0x23e   : > { %1202 = vrot.lane.b32.xlu0 %v981_v31, %s2955_s15  ;;  %1196 = vrot.lane.b32.xlu1 %v981_v31, %s2956_s16 }
 0x23f   : > { %v983_v33 = vpop.f32.mrf.mxu0 }
 0x241   : > { %v2730_v35 = vpop.f32.mrf.mxu0 }
 0x242   : > { %1199 = vrot.lane.b32.xlu1 %v981_v31, %s2957_s23 }
 0x243   : > { %v3228_v36 = vpop.f32.mrf.mxu0 }
 0x245   : > { %v2737_v38 = vpop.f32.mrf.mxu0 }
 0x246   : > { %1050 = vrot.lane.b32.xlu1 %v918_v37, %s2956_s16 }
 0x247   : > { %v1046_v39 = vpop.f32.mrf.mxu0 }
 0x249   : > { %v2738_v40 = vpop.f32.mrf.mxu0 }
 0x24a   : > { %1053 = vrot.lane.b32.xlu1 %v918_v37, %s2957_s23 }
 0x24e   : > { %1056 = vrot.lane.b32.xlu1 %v918_v37, %s2955_s15 }
 0x2b0   : > { %v1203_v48 = vpop.permute.xlu0 %1202  ;;  %v1197_v49 = vpop.permute.xlu1 %1196 }
 0x2b1   : > { %v1221_v52 = vcombine.low %v1197_v49, %v1203_v48  ;;  %v1222_v53 = vcombine.high %v1197_v49, %v1203_v48 }
 0x2b3   : > { %v1229_v58 = vrot.slane %v1221_v52, %v3237_v51  ;;  %v1236_v59 = vrot.slane %v1222_v53, %v3237_v51 }
 0x2b4   : > { %v1200_v54 = vpop.permute.xlu1 %1199 }
 0x2b5   : > { %v1205_v55 = vcombine.low %v981_v31, %v1200_v54  ;;  %v1206_v56 = vcombine.high %v981_v31, %v1200_v54 }
 0x2b7   : > { %v1213_v60 = vrot.slane %v1205_v55, %v3237_v51  ;;  %v1220_v61 = vrot.slane %v1206_v56, %v3237_v51 }
 0x2b8   : > { %v1051_v62 = vpop.permute.xlu1 %1050 }
 0x2b9   : > { %v1237_v63 = vcombine.low %v1213_v60, %v1229_v58  ;;  %v1238_v0 = vcombine.high %v1213_v60, %v1229_v58  ;;  %v1253_v2 = vcombine.low %v1220_v61, %v1236_v59  ;;  %v1254_v3 = vcombine.high %v1220_v61, %v1236_v59 }
 0x2bb   : > { %v1245_v4 = vrot.slane %v1237_v63, %v3240_v57  ;;  %v1252_v5 = vrot.slane %v1238_v0, %v3240_v57  ;;  %v1261_v6 = vrot.slane %v1253_v2, %v3240_v57  ;;  %v1268_v7 = vrot.slane %v1254_v3, %v3240_v57 }
 0x2bc   : > { %v1054_v8 = vpop.permute.xlu1 %1053 }
 0x2bd   : > { %v1273_v10 = vcombine.low %v1245_v4, %v1252_v5  ;;  %v2634_v11 = vcombine.high %v1245_v4, %v1252_v5  ;;  %v1289_v12 = vcombine.low %v1261_v6, %v1268_v7  ;;  %v2635_v13 = vcombine.high %v1261_v6, %v1268_v7 }
 0x2be   : > { %v1059_v14 = vcombine.low %v918_v37, %v1054_v8  ;;  %v1060_v15 = vcombine.high %v918_v37, %v1054_v8 }
 0x2bf   : > { %v1280_v16 = vrot.slane %v1273_v10, %v3237_v51  ;;  %v1288_v17 = vrot.slane %v2634_v11, %v3237_v51  ;;  %v1296_v18 = vrot.slane %v1289_v12, %v3237_v51  ;;  %v1304_v19 = vrot.slane %v2635_v13, %v3237_v51 }
 0x2c0   : > { %v1057_v20 = vpop.permute.xlu1 %1056  ;;  %v1067_v25 = vrot.slane %v1059_v14, %v3237_v51  ;;  %v1074_v26 = vrot.slane %v1060_v15, %v3237_v51 }
 0x2c1   : > { %v1075_v21 = vcombine.low %v1051_v62, %v1057_v20  ;;  %v1076_v22 = vcombine.high %v1051_v62, %v1057_v20  ;;  %v1305_v23 = vcombine.low %v1280_v16, %v1288_v17  ;;  %v1321_v24 = vcombine.low %v1296_v18, %v1304_v19 }
 0x2c2   : > { %v1306_v31 = vcombine.high %v1280_v16, %v1288_v17  ;;  %v1322_v32 = vcombine.high %v1296_v18, %v1304_v19 }
 0x2c3   : > { %v1083_v27 = vrot.slane %v1075_v21, %v3237_v51  ;;  %v1090_v28 = vrot.slane %v1076_v22, %v3237_v51  ;;  %v1313_v29 = vrot.slane %v1305_v23, %v3240_v57  ;;  %v1329_v30 = vrot.slane %v1321_v24, %v3240_v57 }
 0x2c4   : > { %v1320_v48 = vrot.slane %v1306_v31, %v3240_v57  ;;  %v1336_v49 = vrot.slane %v1322_v32, %v3240_v57  ;;  %v1687_v22 = vand.u32 127, %v1064_v43 }
 0x2c5   : > { %v1091_v33 = vcombine.low %v1067_v25, %v1083_v27  ;;  %v1092_v34 = vcombine.high %v1067_v25, %v1083_v27  ;;  %v1107_v35 = vcombine.low %v1074_v26, %v1090_v28  ;;  %v1108_v37 = vcombine.high %v1074_v26, %v1090_v28 }
 0x2c6   : > { %v1337_v38 = vcombine.low %v1313_v29, %v1329_v30  ;;  %v1338_v39 = vcombine.high %v1313_v29, %v1329_v30  ;;  %v1339_v0 = vcombine.low %v1320_v48, %v1336_v49  ;;  %v1340_v2 = vcombine.high %v1320_v48, %v1336_v49 }
 0x2c7   : > { %v1099_v40 = vrot.slane %v1091_v33, %v3240_v57  ;;  %v1106_v41 = vrot.slane %v1092_v34, %v3240_v57  ;;  %v1115_v42 = vrot.slane %v1107_v35, %v3240_v57  ;;  %v1122_v44 = vrot.slane %v1108_v37, %v3240_v57 }
 0x2c8   : > { %v1491_v45 = vpack.c.bf16 %v1337_v38, %v1337_v38  ;;  %v1492_v46 = vpack.c.bf16 %v1338_v39, %v1338_v39  ;;  %v1493_v10 = vpack.c.bf16 %v1339_v0, %v1339_v0  ;;  %v1494_v11 = vpack.c.bf16 %v1340_v2, %v1340_v2 }
 0x2c9   : > { %v1127_v50 = vcombine.low %v1099_v40, %v1106_v41  ;;  %v2632_v52 = vcombine.high %v1099_v40, %v1106_v41  ;;  %v1143_v53 = vcombine.low %v1115_v42, %v1122_v44  ;;  %v2633_v54 = vcombine.high %v1115_v42, %v1122_v44 }
 0x2ca   : > { %v1500_v55 = vsel %vm1495_vm3, %v1491_v45, 0  ;;  %v1546_v56 = vsel %vm1495_vm3, %v1492_v46, 0  ;;  %v1592_v16 = vsel %vm1495_vm3, %v1493_v10, 0  ;;  %v1638_v17 = vsel %vm1495_vm3, %v1494_v11, 0 }
 0x2cb   : > { %v1134_v58 = vrot.slane %v1127_v50, %v3237_v51  ;;  %v1142_v59 = vrot.slane %v2632_v52, %v3237_v51  ;;  %v1150_v60 = vrot.slane %v1143_v53, %v3237_v51  ;;  %v1158_v61 = vrot.slane %v2633_v54, %v3237_v51  ;;  %2740 = vmatpush3.bf16.xpose.msra.mxu1 %v1500_v55  ;;  %v2628_v54 = vld [vmem:[%s3529_s24] ss:$0 sm:$0xff] }
 0x2cc   : > { %2746 = vmatpush3.bf16.xpose.msra.mxu0 %v1546_v56  ;;  %2751 = vmatprep.subr.bf16.mxu1 %v2953_v9  ;;  %vm1688_vm4 = vcmp.ge.s32.totalorder %v3234_v47, %v1687_v22  ;;  %v1044_v55 = vadd.f32 %v2628_v54, %v3228_v36 }
 0x2cd   : > { %2757 = vmatprep.subr.bf16.mxu0 %v2953_v9  ;;  %v1159_v62 = vcombine.low %v1134_v58, %v1142_v59  ;;  %v1175_v63 = vcombine.low %v1150_v60, %v1158_v61  ;;  %v1160_v3 = vcombine.high %v1134_v58, %v1142_v59  ;;  %v1176_v4 = vcombine.high %v1150_v60, %v1158_v61 }
 0x2cf   : > { %v1167_v5 = vrot.slane %v1159_v62, %v3240_v57  ;;  %v1183_v6 = vrot.slane %v1175_v63, %v3240_v57  ;;  %v1174_v14 = vrot.slane %v1160_v3, %v3240_v57  ;;  %v1190_v15 = vrot.slane %v1176_v4, %v3240_v57 }
 0x2d1   : > { %v1191_v7 = vcombine.low %v1167_v5, %v1183_v6  ;;  %v1192_v8 = vcombine.high %v1167_v5, %v1183_v6  ;;  %v1193_v18 = vcombine.low %v1174_v14, %v1190_v15  ;;  %v1194_v19 = vcombine.high %v1174_v14, %v1190_v15 }
 0x2d3   : > { %v1487_v12 = vpack.c.bf16 %v1191_v7, %v1191_v7  ;;  %v1488_v13 = vpack.c.bf16 %v1192_v8, %v1192_v8  ;;  %v1489_v20 = vpack.c.bf16 %v1193_v18, %v1193_v18  ;;  %v1490_v21 = vpack.c.bf16 %v1194_v19, %v1194_v19 }
 0x2d5   : > { %2742 = vmatmul.mubr.msk.bf16.vlgmr.msra.gmra.mxu1 %vm1495_vm3, %v1487_v12  ;;  %2748 = vmatmul.mubr.msk.bf16.vlgmr.msra.gmra.mxu0 %vm1495_vm3, %v1488_v13 }
 0x2d6   : > { %2752 = vmatpush3.bf16.xpose.msra.mxu1 %v1592_v16  ;;  %2758 = vmatpush3.bf16.xpose.msra.mxu0 %v1638_v17 }
 0x2d7   : > { %2753 = vmatprep.mubr.msk.bf16.mxu1 %vm2954_vm2, %v2953_v9  ;;  %2759 = vmatprep.mubr.msk.bf16.mxu0 %vm2954_vm2, %v2953_v9 }
 0x2d8   : > { %2763 = vmatprep.subr.bf16.mxu1 %v2953_v9  ;;  %2769 = vmatprep.subr.bf16.mxu0 %v2953_v9 }
 0x2dd   : > { %2754 = vmatmul.mubr.msk.bf16.vlgmr.msra.gmra.mxu1 %vm1495_vm3, %v1489_v20  ;;  %2760 = vmatmul.mubr.msk.bf16.vlgmr.msra.gmra.mxu0 %vm1495_vm3, %v1490_v21 }
 0x2de   : > { %2765 = vmatprep.mubr.msk.bf16.mxu1 %vm2954_vm2, %v2953_v9  ;;  %2771 = vmatprep.mubr.msk.bf16.mxu0 %vm2954_vm2, %v2953_v9 }
 0x395   : > { %v1536_v23 = vpop.f32.mrf.mxu1  ;;  %v1582_v24 = vpop.f32.mrf.mxu0 }
 0x396   : > { %v1680_v25 = vmul.f32 0.35355338, %v1536_v23  ;;  %v1681_v26 = vmul.f32 0.35355338, %v1582_v24 }
 0x397   : > { %v2743_v27 = vpop.f32.mrf.mxu1  ;;  %v2749_v28 = vpop.f32.mrf.mxu0 }
 0x398   : > { %v1691_v29 = vsel %vm1688_vm4, %v1680_v25, -inf  ;;  %v1692_v30 = vsel %vm1688_vm4, %v1681_v26, -inf }
 0x399   : > { %v1539_v31 = vpop.f32.mrf.mxu1  ;;  %v1585_v32 = vpop.f32.mrf.mxu0  ;;  %v1695_v33 = vsel %vm1495_vm3, %v1691_v29, -inf  ;;  %v1698_v43 = vsel %vm1495_vm3, %v1692_v30, -inf }
 0x39a   : > { %1696 = vmax.xlane.f32.xlu1 %v1695_v33  ;;  %1699 = vmax.xlane.f32.xlu0 %v1698_v43 }
 0x39b   : > { %v2744_v34 = vpop.f32.mrf.mxu1  ;;  %v2750_v35 = vpop.f32.mrf.mxu0 }
 0x39d   : > { %v1628_v37 = vpop.f32.mrf.mxu1  ;;  %v1674_v38 = vpop.f32.mrf.mxu0 }
 0x39e   : > { %v1682_v39 = vmul.f32 0.35355338, %v1628_v37  ;;  %v1683_v40 = vmul.f32 0.35355338, %v1674_v38 }
 0x39f   : > { %v2755_v41 = vpop.f32.mrf.mxu1  ;;  %v2761_v42 = vpop.f32.mrf.mxu0 }
 0x3a0   : > { %v1693_v44 = vsel %vm1688_vm4, %v1682_v39, -inf  ;;  %v1694_v49 = vsel %vm1688_vm4, %v1683_v40, -inf }
 0x3a1   : > { %v1631_v45 = vpop.f32.mrf.mxu1  ;;  %v1677_v46 = vpop.f32.mrf.mxu0  ;;  %v1701_v48 = vsel %vm1495_vm3, %v1693_v44, -inf  ;;  %v1704_v53 = vsel %vm1495_vm3, %v1694_v49, -inf }
 0x3a2   : > { %1702 = vmax.xlane.f32.xlu1 %v1701_v48 }
 0x3a3   : > { %v2756_v50 = vpop.f32.mrf.mxu1  ;;  %v2762_v52 = vpop.f32.mrf.mxu0 }
 0x3a6   : > { %1705 = vmax.xlane.f32.xlu1 %v1704_v53 }
 0x3b7   : > { %1345 = vrot.lane.b32.xlu1 %v1044_v55, %s2957_s23 }
 0x423   : > { %v1697_v56 = vpop.xlane.xlu1 %1696  ;;  %v1700_v58 = vpop.xlane.xlu0 %1699 }
 0x424   : > { %v1707_v59 = vsub.f32 %v1691_v29, %v1697_v56  ;;  %v1708_v60 = vsub.f32 %v1692_v30, %v1700_v58 }
 0x426   : > { %v1711_v47 = vmul.f32 1.442695, %v1707_v59  ;;  %v1713_v61 = vmul.f32 1.442695, %v1708_v60 }
 0x428   : > { %2893 = vpow2.f32 %v1711_v47 }
 0x429   : > { %2895 = vpow2.f32 %v1713_v61 }
 0x42b   : > { %v1703_v2 = vpop.xlane.xlu1 %1702 }
 0x42c   : > { %v1709_v4 = vsub.f32 %v1693_v44, %v1703_v2 }
 0x42e   : > { %v1715_v6 = vmul.f32 1.442695, %v1709_v4 }
 0x42f   : > { %v1706_v3 = vpop.xlane.xlu1 %1705 }
 0x430   : > { %v1710_v5 = vsub.f32 %v1694_v49, %v1706_v3  ;;  %2897 = vpow2.f32 %v1715_v6 }
 0x432   : > { %v1717_v7 = vmul.f32 1.442695, %v1710_v5 }
 0x433   : > { %v1346_v13 = vpop.permute.xlu1 %1345 }
 0x434   : > { %2899 = vpow2.f32 %v1717_v7  ;;  %v1351_v16 = vcombine.low %v1044_v55, %v1346_v13  ;;  %v1352_v17 = vcombine.high %v1044_v55, %v1346_v13 }
 0x435   : > { %v3315_v62 = vpop.eup %2893 }
 0x436   : > { %v3317_v63 = vpop.eup %2895  ;;  %v1719_v0 = vsel %vm1495_vm3, %v3315_v62, 0.0  ;;  %v1359_v22 = vrot.slane %v1351_v16, %v3237_v51  ;;  %v1366_v23 = vrot.slane %v1352_v17, %v3237_v51 }
 0x437   : > { %1720 = vadd.xlane.f32.xlu0 %v1719_v0  ;;  %v1722_v36 = vsel %vm1495_vm3, %v3317_v63, 0.0 }
 0x438   : > { %1723 = vadd.xlane.f32.xlu1 %v1722_v36 }
 0x43d   : > { %v3325_v8 = vpop.eup %2897 }
 0x43e   : > { %v1725_v11 = vsel %vm1495_vm3, %v3325_v8, 0.0 }
 0x441   : > { %v3327_v10 = vpop.eup %2899 }
 0x442   : > { %v1728_v12 = vsel %vm1495_vm3, %v3327_v10, 0.0 }
 0x449   : > { %1348 = vrot.lane.b32.xlu1 %v1044_v55, %s2955_s15  ;;  %s3533_s15 = sld [smem:[#allocation17_spill]] }
 0x44d   : > { %1342 = vrot.lane.b32.xlu0 %v1044_v55, %s2956_s16 }
 0x44f   : > { %s3534_s16 = scalar_lea.vmem %s3533_s15, %s3087_s30 }
 0x46c   : > { %1726 = vadd.xlane.f32.xlu0 %v1725_v11 }
 0x46d   : > { %1729 = vadd.xlane.f32.xlu1 %v1728_v12 }
 0x4c0   : > { %v1721_v14 = vpop.xlane.xlu0 %1720 }
 0x4c1   : > { %v1724_v15 = vpop.xlane.xlu1 %1723  ;;  %2901 = vrcp.f32 %v1721_v14 }
 0x4c2   : > { %2903 = vrcp.f32 %v1724_v15 }
 0x4c4   : > { %v1343_v18 = vpop.permute.xlu0 %1342 }
 0x4c5   : > { %v1349_v19 = vpop.permute.xlu1 %1348 }
 0x4c6   : > { %v1367_v20 = vcombine.low %v1343_v18, %v1349_v19  ;;  %v1368_v21 = vcombine.high %v1343_v18, %v1349_v19  ;;  %v2879_v18 = vld [vmem:[%s3530_s3 + $0x8] sm:$0xff]  }
 0x4c8   : > { %v1375_v24 = vrot.slane %v1367_v20, %v3237_v51  ;;  %v1382_v25 = vrot.slane %v1368_v21, %v3237_v51 }
 0x4ca   : > { %v1383_v26 = vcombine.low %v1359_v22, %v1375_v24  ;;  %v1384_v27 = vcombine.high %v1359_v22, %v1375_v24  ;;  %v1399_v28 = vcombine.low %v1366_v23, %v1382_v25  ;;  %v1400_v29 = vcombine.high %v1366_v23, %v1382_v25 }
 0x4cc   : > { %v1391_v30 = vrot.slane %v1383_v26, %v3240_v57  ;;  %v1398_v31 = vrot.slane %v1384_v27, %v3240_v57  ;;  %v1407_v32 = vrot.slane %v1399_v28, %v3240_v57  ;;  %v1414_v33 = vrot.slane %v1400_v29, %v3240_v57 }
 0x4ce   : > { %v1419_v43 = vcombine.low %v1391_v30, %v1398_v31  ;;  %v2636_v34 = vcombine.high %v1391_v30, %v1398_v31  ;;  %v1435_v35 = vcombine.low %v1407_v32, %v1414_v33  ;;  %v2637_v37 = vcombine.high %v1407_v32, %v1414_v33  ;;  %v2902_v48 = vpop.eup %2901 }
 0x4cf   : > { %v2904_v54 = vpop.eup %2903  ;;  %v1735_v61 = vmul.f32 %v2902_v48, %v3315_v62 }
 0x4d0   : > { %v1426_v38 = vrot.slane %v1419_v43, %v3237_v51  ;;  %v1434_v39 = vrot.slane %v2636_v34, %v3237_v51  ;;  %v1442_v40 = vrot.slane %v1435_v35, %v3237_v51  ;;  %v1450_v41 = vrot.slane %v2637_v37, %v3237_v51 }
 0x4d1   : > { %v1736_v0 = vmul.f32 %v2904_v54, %v3317_v63  ;;  %v1739_v5 = vpack.c.bf16 %v1735_v61, %v1735_v61 }
 0x4d2   : > { %v1451_v42 = vcombine.low %v1426_v38, %v1434_v39  ;;  %v1467_v44 = vcombine.low %v1442_v40, %v1450_v41  ;;  %v1452_v45 = vcombine.high %v1426_v38, %v1434_v39  ;;  %v1468_v46 = vcombine.high %v1442_v40, %v1450_v41 }
 0x4d3   : > { %v1740_v6 = vpack.c.bf16 %v1736_v0, %v1736_v0 }
 0x4d4   : > { %v1459_v49 = vrot.slane %v1451_v42, %v3240_v57  ;;  %v1475_v50 = vrot.slane %v1467_v44, %v3240_v57  ;;  %v1466_v52 = vrot.slane %v1452_v45, %v3240_v57  ;;  %v1482_v53 = vrot.slane %v1468_v46, %v3240_v57  ;;  %v2880_v46 = vld [vmem:[%s3530_s3] sm:$0xff]  }
 0x4d6   : > { %v1483_v55 = vcombine.low %v1459_v49, %v1475_v50  ;;  %v1484_v56 = vcombine.high %v1459_v49, %v1475_v50  ;;  %v1485_v58 = vcombine.low %v1466_v52, %v1482_v53  ;;  %v1486_v59 = vcombine.high %v1466_v52, %v1482_v53 }
 0x4d8   : > { %v1743_v60 = vpack.c.bf16 %v1483_v55, %v1483_v55  ;;  %v1744_v47 = vpack.c.bf16 %v1484_v56, %v1484_v56  ;;  %v1745_v3 = vpack.c.bf16 %v1485_v58, %v1485_v58  ;;  %v1746_v4 = vpack.c.bf16 %v1486_v59, %v1486_v59 }
 0x4da   : > { %v1752_v36 = vsel %vm1750_vm5, %v1743_v60, 0  ;;  %v1798_v2 = vsel %vm1750_vm5, %v1744_v47, 0  ;;  %v1844_v62 = vsel %vm1750_vm5, %v1745_v3, 0  ;;  %v1890_v63 = vsel %vm1750_vm5, %v1746_v4, 0 }
 0x4db   : > { %2764 = vmatpush3.bf16.msra.mxu1 %v1752_v36  ;;  %2770 = vmatpush3.bf16.msra.mxu0 %v1798_v2 }
 0x4dc   : > { %2775 = vmatprep.subr.bf16.mxu1 %v2953_v9  ;;  %2781 = vmatprep.subr.bf16.mxu0 %v2953_v9 }
 0x4de   : > { %2766 = vmatmul.mubr.msk.bf16.vlgmr.msra.gmra.mxu1 %vm1495_vm3, %v1739_v5  ;;  %2772 = vmatmul.mubr.msk.bf16.vlgmr.msra.gmra.mxu0 %vm1495_vm3, %v1740_v6 }
 0x4df   : > { %2776 = vmatpush3.bf16.msra.mxu1 %v1844_v62  ;;  %2782 = vmatpush3.bf16.msra.mxu0 %v1890_v63 }
 0x4e0   : > { %2777 = vmatprep.mubr.msk.bf16.mxu1 %vm2954_vm2, %v2953_v9  ;;  %2783 = vmatprep.mubr.msk.bf16.mxu0 %vm2954_vm2, %v2953_v9 }
 0x4e1   : > { %2787 = vmatprep.subr.bf16.mxu1 %v2953_v9  ;;  %2795 = vmatprep.subr.bf16.mxu0 %v2953_v9 }
 0x4f5   : > { %v1727_v7 = vpop.xlane.xlu0 %1726 }
 0x4f6   : > { %2905 = vrcp.f32 %v1727_v7  ;;  %v1730_v11 = vpop.xlane.xlu1 %1729 }
 0x4f7   : > { %2907 = vrcp.f32 %v1730_v11 }
 0x503   : > { %v2906_v12 = vpop.eup %2905 }
 0x504   : > { %v2908_v13 = vpop.eup %2907  ;;  %v1737_v14 = vmul.f32 %v2906_v12, %v3325_v8 }
 0x505   : > { %v1738_v15 = vmul.f32 %v2908_v13, %v3327_v10 }
 0x506   : > { %v1741_v16 = vpack.c.bf16 %v1737_v14, %v1737_v14 }
 0x507   : > { %v1742_v17 = vpack.c.bf16 %v1738_v15, %v1738_v15 }
 0x508   : > { %2778 = vmatmul.mubr.msk.bf16.vlgmr.msra.gmra.mxu1 %vm1495_vm3, %v1741_v16 }
 0x509   : > { %2784 = vmatmul.mubr.msk.bf16.vlgmr.msra.gmra.mxu0 %vm1495_vm3, %v1742_v17  ;;  %2791 = vmatprep.mubr.msk.bf16.mxu1 %vm2954_vm2, %v2953_v9  ;;  %v2648_v17 = vld [vmem:[%s3532_s22] ss:$0 sm:$0xff] }
 0x50a   : > { %2799 = vmatprep.mubr.msk.bf16.mxu0 %vm2954_vm2, %v2953_v9  ;;  %2788 = vmatpush3.bf16.msra.mxu1 %v2879_v18 }
 0x50b   : > { %2789 = vmatprep.subr.bf16.mxu1 %v2953_v9 }
 0x50e   : > { %2790 = vmatpush3.bf16.msra.mxu1 %v2880_v46  ;;  %v2889_v46 = vld [vmem:[%s3162_s11 + $0x8] sm:$0xff]  }
 0x50f   : > { %2803 = vmatprep.subr.bf16.mxu1 %v2953_v9 }
 0x59e   : > { %v1788_v19 = vpop.f32.mrf.mxu1  ;;  %v1834_v8 = vpop.f32.mrf.mxu0 }
 0x5a0   : > { %v2767_v20 = vpop.f32.mrf.mxu1  ;;  %v2773_v10 = vpop.f32.mrf.mxu0 }
 0x5a2   : > { %v1791_v21 = vpop.f32.mrf.mxu1  ;;  %v1837_v22 = vpop.f32.mrf.mxu0 }
 0x5a4   : > { %v2768_v23 = vpop.f32.mrf.mxu1  ;;  %v2774_v24 = vpop.f32.mrf.mxu0 }
 0x5c8   : > { %v1880_v25 = vpop.f32.mrf.mxu1 }
 0x5c9   : > { %v1932_v26 = vcombine.low %v1788_v19, %v1880_v25  ;;  %v1933_v27 = vcombine.high %v1788_v19, %v1880_v25  ;;  %v1926_v28 = vpop.f32.mrf.mxu0 }
 0x5ca   : > { %v1948_v29 = vcombine.low %v1834_v8, %v1926_v28  ;;  %v1949_v30 = vcombine.high %v1834_v8, %v1926_v28  ;;  %v2779_v31 = vpop.f32.mrf.mxu1  ;;  %v2881_v28 = vld [vmem:[%s3148_s17 + $0x8] sm:$0xff]  }
 0x5cb   : > { %v1940_v32 = vrot.slane %v1932_v26, %v3237_v51  ;;  %v1947_v33 = vrot.slane %v1933_v27, %v3237_v51  ;;  %v2785_v43 = vpop.f32.mrf.mxu0  ;;  %2796 = vmatpush3.bf16.msra.mxu0 %v2881_v28 }
 0x5cc   : > { %v1956_v34 = vrot.slane %v1948_v29, %v3237_v51  ;;  %v1963_v35 = vrot.slane %v1949_v30, %v3237_v51  ;;  %v1883_v37 = vpop.f32.mrf.mxu1  ;;  %2797 = vmatprep.subr.bf16.mxu0 %v2953_v9 }
 0x5cd   : > { %v1929_v38 = vpop.f32.mrf.mxu0 }
 0x5ce   : > { %v1964_v39 = vcombine.low %v1940_v32, %v1956_v34  ;;  %v1965_v40 = vcombine.high %v1940_v32, %v1956_v34  ;;  %v1980_v41 = vcombine.low %v1947_v33, %v1963_v35  ;;  %v1981_v42 = vcombine.high %v1947_v33, %v1963_v35  ;;  %v2780_v44 = vpop.f32.mrf.mxu1  ;;  %v2652_v33 = vld [vmem:[%s3534_s16] ss:$0 sm:$0xff] }
 0x5cf   : > { %v2786_v45 = vpop.f32.mrf.mxu0  ;;  %v2887_v44 = vld [vmem:[%s3162_s11 + $0x18] sm:$0xff]  }
 0x5d0   : > { %v1972_v48 = vrot.slane %v1964_v39, %v3240_v57  ;;  %v1979_v49 = vrot.slane %v1965_v40, %v3240_v57  ;;  %v1988_v50 = vrot.slane %v1980_v41, %v3240_v57  ;;  %v1995_v52 = vrot.slane %v1981_v42, %v3240_v57  ;;  %v2883_v39 = vld [vmem:[%s3162_s11 + $0x38] sm:$0xff]   ;;  %v2884_v40 = vld [vmem:[%s3162_s11 + $0x30] sm:$0xff]   ;;  %v2885_v41 = vld [vmem:[%s3162_s11 + $0x28] sm:$0xff]  }
 0x5d1   : > { %v2886_v42 = vld [vmem:[%s3162_s11 + $0x20] sm:$0xff]   ;;  %v2888_v45 = vld [vmem:[%s3162_s11 + $0x10] sm:$0xff]  }
 0x5d2   : > { %v2000_v53 = vcombine.low %v1972_v48, %v1979_v49  ;;  %v2646_v54 = vcombine.high %v1972_v48, %v1979_v49  ;;  %v2016_v55 = vcombine.low %v1988_v50, %v1995_v52  ;;  %v2647_v56 = vcombine.high %v1988_v50, %v1995_v52  ;;  %v2890_v48 = vld [vmem:[%s3162_s11] sm:$0xff]  }
 0x5d3   : > { %v2654_v49 = vld [vmem:[%s803_s9] ss:$0 sm:$0xff] }
 0x5d4   : > { %v2007_v58 = vrot.slane %v2000_v53, %v3237_v51  ;;  %v2015_v59 = vrot.slane %v2646_v54, %v3237_v51  ;;  %v2023_v60 = vrot.slane %v2016_v55, %v3237_v51  ;;  %v2031_v47 = vrot.slane %v2647_v56, %v3237_v51 }
 0x5d6   : > { %v2033_v61 = vcombine.high %v2007_v58, %v2015_v59  ;;  %v2049_v0 = vcombine.high %v2023_v60, %v2031_v47  ;;  %v2032_v36 = vcombine.low %v2007_v58, %v2015_v59  ;;  %v2048_v2 = vcombine.low %v2023_v60, %v2031_v47 }
 0x5d8   : > { %v2047_v3 = vrot.slane %v2033_v61, %v3240_v57  ;;  %v2063_v4 = vrot.slane %v2049_v0, %v3240_v57  ;;  %v2040_v5 = vrot.slane %v2032_v36, %v3240_v57  ;;  %v2056_v6 = vrot.slane %v2048_v2, %v3240_v57 }
 0x5da   : > { %v2066_v62 = vcombine.low %v2047_v3, %v2063_v4  ;;  %v2065_v63 = vcombine.high %v2040_v5, %v2056_v6  ;;  %v2064_v7 = vcombine.low %v2040_v5, %v2056_v6  ;;  %v2067_v51 = vcombine.high %v2047_v3, %v2063_v4  ;;  %v2658_v3 = vld [vmem:[%s811_s10] ss:$0 sm:$0xff] }
 0x5dc   : > { %2073 = vrot.lane.b32.xlu1 %v2066_v62, %s2960_s5  ;;  %2069 = vrot.lane.b32.xlu0 %v2065_v63, %s2961_s7 }
 0x5e0   : > { %2077 = vrot.lane.b32.xlu0 %v2067_v51, %s2962_s18 }
 0x64e   : > { %v2070_v11 = vpop.permute.xlu0 %2069  ;;  %v2074_v12 = vpop.permute.xlu1 %2073 }
 0x64f   : > { %v2080_v13 = vsel %vm1495_vm3, %v2064_v7, %v2070_v11 }
 0x650   : > { %v2082_v15 = vsel %vm2081_vm6, %v2080_v13, %v2074_v12 }
 0x652   : > { %v2078_v14 = vpop.permute.xlu0 %2077 }
 0x653   : > { %v2084_v57 = vsel %vm2083_vm7, %v2082_v15, %v2078_v14 }
 0x654   : > { %v2085_v16 = vpack.c.bf16 %v2084_v57, %v2084_v57 }
 0x656   : > { %2792 = vmatmul.mubr.msk.bf16.vlgmr.msra.gmra.mxu1 %vm827_vm1, %v2085_v16 }
 0x657   : > { %2819 = vmatprep.mubr.msk.bf16.mxu1 %vm2954_vm2, %v2953_v9  ;;  %2804 = vmatpush3.bf16.msra.mxu1 %v2883_v39 }
 0x658   : > { %2805 = vmatprep.subr.bf16.mxu1 %v2953_v9 }
 0x65b   : > { %2806 = vmatpush3.bf16.msra.mxu1 %v2884_v40 }
 0x65c   : > { %2807 = vmatprep.subr.bf16.mxu1 %v2953_v9 }
 0x65f   : > { %2808 = vmatpush3.bf16.msra.mxu1 %v2885_v41 }
 0x660   : > { %2809 = vmatprep.subr.bf16.mxu1 %v2953_v9 }
 0x663   : > { %2810 = vmatpush3.bf16.msra.mxu1 %v2886_v42 }
 0x664   : > { %2811 = vmatprep.subr.bf16.mxu1 %v2953_v9 }
 0x667   : > { %2812 = vmatpush3.bf16.msra.mxu1 %v2887_v44 }
 0x668   : > { %2813 = vmatprep.subr.bf16.mxu1 %v2953_v9 }
 0x66b   : > { %2814 = vmatpush3.bf16.msra.mxu1 %v2888_v45 }
 0x66c   : > { %2815 = vmatprep.subr.bf16.mxu1 %v2953_v9 }
 0x66f   : > { %2816 = vmatpush3.bf16.msra.mxu1 %v2889_v46 }
 0x670   : > { %2817 = vmatprep.subr.bf16.mxu1 %v2953_v9 }
 0x673   : > { %2818 = vmatpush3.bf16.msra.mxu1 %v2890_v48 }
 0x716   : > { %v2146_v18 = vpop.f32.mrf.mxu1 }
 0x717   : > { %v2147_v19 = vadd.f32 %v2648_v17, %v2146_v18 }
 0x718   : > { %v2793_v8 = vpop.f32.mrf.mxu1 }
 0x719   : > { %v3403_v20 = vadd.f32 %v2147_v19, %v3172_v1  ;;  %v2882_v1 = vld [vmem:[%s3148_s17] sm:$0xff]   ;;  %s3535_s17 = scalar_lea.vmem %s3478_s12, %s3087_s30 }
 0x71a   : > { %v2149_v10 = vpop.f32.mrf.mxu1  ;;  %2798 = vmatpush3.bf16.msra.mxu0 %v2882_v1  ;;  %v2653_v34 = vld [vmem:[%s3535_s17] ss:$0 sm:$0xff] }
 0x71b   : > { %v2155_v21 = vsel %vm827_vm1, %v3403_v20, 0.0 }
 0x71c   : > { %2156 = vadd.xlane.f32.xlu1 %v2155_v21  ;;  %v2794_v22 = vpop.f32.mrf.mxu1 }
 0x7a5   : > { %v2157_v23 = vpop.xlane.xlu1 %2156 }
 0x7a6   : > { %v2158_v24 = vmul.f32 0.03125, %v2157_v23 }
 0x7a8   : > { %v2159_v25 = vsub.f32 %v3403_v20, %v2158_v24 }
 0x7aa   : > { %v2160_v26 = vmul.f32 %v2159_v25, %v2159_v25 }
 0x7ac   : > { %v2161_v27 = vsel %vm827_vm1, %v2160_v26, 0.0 }
 0x7ad   : > { %2162 = vadd.xlane.f32.xlu0 %v2161_v27 }
 0x836   : > { %v2163_v29 = vpop.xlane.xlu0 %2162 }
 0x837   : > { %v2164_v30 = vmul.f32 0.03125, %v2163_v29 }
 0x839   : > { %v2165_v31 = vadd.f32 1e-05, %v2164_v30 }
 0x83b   : > { %2909 = vrsqrt.f32 %v2165_v31 }
 0x848   : > { %v2910_v32 = vpop.eup %2909 }
 0x849   : > { %v2167_v43 = vmul.f32 %v2910_v32, %v2159_v25 }
 0x84b   : > { %v2174_v35 = vmul.f32 %v2652_v33, %v2167_v43 }
 0x84d   : > { %v2181_v37 = vadd.f32 %v2653_v34, %v2174_v35 }
 0x84f   : > { %v2182_v38 = vpack.c.bf16 %v2181_v37, %v2181_v37 }
 0x851   : > { %2800 = vmatmul.mubr.msk.bf16.vlgmr.msra.gmra.mxu0 %vm827_vm1, %v2182_v38 }
 0x911   : > { %v2243_v50 = vpop.f32.mrf.mxu0 }
 0x912   : > { %v2244_v52 = vadd.f32 %v2654_v49, %v2243_v50 }
 0x913   : > { %v2801_v53 = vpop.f32.mrf.mxu0 }
 0x914   : > { %v2250_v54 = vmul.f32 0.044715, %v2244_v52  ;;  %v2249_v61 = vmul.f32 0.5, %v2244_v52 }
 0x915   : > { %v2246_v55 = vpop.f32.mrf.mxu0 }
 0x916   : > { %v2251_v56 = vmul.f32 %v2250_v54, %v2244_v52 }
 0x917   : > { %v2802_v58 = vpop.f32.mrf.mxu0 }
 0x918   : > { %v2252_v59 = vmul.f32 %v2251_v56, %v2244_v52 }
 0x91a   : > { %v2253_v60 = vadd.f32 %v2252_v59, %v2244_v52 }
 0x91c   : > { %v2254_v47 = vmul.f32 0.7978846, %v2253_v60 }
 0x91e   : > { %2911 = vtanh.f32 %v2254_v47 }
 0x92b   : > { %v2912_v9 = vpop.eup %2911 }
 0x92c   : > { %v2256_v0 = vadd.f32 1.0, %v2912_v9 }
 0x92e   : > { %v2257_v36 = vmul.f32 %v2256_v0, %v2249_v61 }
 0x930   : > { %v2258_v2 = vpack.c.bf16 %v2257_v36, %v2257_v36 }
 0x932   : > { %2820 = vmatmul.mubr.bf16.vlgmr.msra.gmra.mxu1 %v2258_v2 }
 0x9f2   : > { %v2364_v4 = vpop.f32.mrf.mxu1 }
 0x9f3   : > { %v2365_v5 = vadd.f32 %v2658_v3, %v2364_v4 }
 0x9f4   : > { %v2821_v6 = vpop.f32.mrf.mxu1 }
 0x9f5   : > { %v2370_v62 = vadd.f32 %v2365_v5, %v3403_v20 }
 0x9f6   : > { %v2367_v63 = vpop.f32.mrf.mxu1 }
 0x9f7   : > { %2371 = vst.msk [vmem:[%s3167_s4] sm:$0xff] %vm827_vm1, %v2370_v62 }
 0x9f8   : > { %v2822_v7 = vpop.f32.mrf.mxu1 }
 0x9f9 PF: > { %s3538_s27 = sld [smem:[#allocation5_spill]] }
 0x9fa   : > { %s3539_s24 = sld [smem:[#allocation3_spill]] }
 0x9fb   : > { %s3540_s25 = sld [smem:[#allocation4_spill]] }
 0x9fc   : > { %s3541_s26 = sld [smem:[#allocation6_spill]] }
 0x9ff   : > { %s27_s28 = sadd.s32 1, %s3538_s27   ;;  %s3542_s27 = sld [smem:[#allocation7_spill]] }
 0xa00   : > { %p24_p8 = scmp.ge.s32.totalorder %s27_s28, 6  }
 0xa02   :  { %26 = sbr.rel (!%p24_p8) target bundleno = 14 (0xe), region = 170 }

</bundles_post_ra>
